<compile_context>
chip_gen: v7x
topology: tpu7x:2x2x1
jax: 0.10.0
libtpu: 0.0.40
codegen_flags: <defaults>
</compile_context>

<pallas_src>
import functools

import jax
import jax.numpy as jnp
from jax import lax
from jax.experimental import pallas as pl
from jax.experimental.pallas import tpu as pltpu


def _attention_kernel(x_ref, wqkv_ref, bqkv_ref, wproj_ref, bproj_ref,
                      out_ref, q_ref, k_ref, v_ref, wav_ref,
                      *, T, D, H, HD, Bb, scale):
    # ---- fused QKV projection over the whole (Bb*T, D) block --------------
    x2 = x_ref[...].reshape(Bb * T, D)                       # native dtype
    qkv = jnp.dot(x2, wqkv_ref[...],
                  preferred_element_type=jnp.float32) + bqkv_ref[...]

    q_all = qkv[:, 0 * D:1 * D]
    k_all = qkv[:, 1 * D:2 * D]
    v_all = qkv[:, 2 * D:3 * D]

    # Lane-dense q/k/v outputs (head split is wrapper-side layout plumbing).
    q_ref[...] = q_all.reshape(Bb, T, D).astype(q_ref.dtype)
    k_ref[...] = k_all.reshape(Bb, T, D).astype(k_ref.dtype)
    v_ref[...] = v_all.reshape(Bb, T, D).astype(v_ref.dtype)

    # ---- per-(batch, head) softmax attention into the wav scratch slab ----
    def batch_body(b, carry):
        qs = q_ref[b] * scale            # scale folded into q, once per elem
        k_b = k_ref[b]
        v_b = v_ref[b]
        # Head loop stays static: head slices are lane-axis slices and Mosaic
        # requires static lane offsets; the batch loop above is the dynamic
        # loop, so live (T,T) temporaries are bounded to one batch element.
        for h in range(H):
            sl = slice(h * HD, (h + 1) * HD)
            qh, kh, vh = qs[:, sl], k_b[:, sl], v_b[:, sl]
            # q @ k^T via dot_general (contract head dim of both) -> no
            # explicit XLU transpose of k per head.
            s = lax.dot_general(qh, kh, (((1,), (1,)), ((), ())),
                                preferred_element_type=jnp.float32)  # (T, T)
            m = jnp.max(s, axis=-1, keepdims=True)
            e = jnp.exp(s - m)                                       # unnorm.
            l = jnp.sum(e, axis=-1, keepdims=True)                   # (T, 1)
            acc = jnp.dot(e.astype(vh.dtype), vh,
                          preferred_element_type=jnp.float32)        # (T, HD)
            # Deferred normalization on the small (T,HD) result, not (T,T).
            # approx=False keeps the 1e-4 output tolerance (approx=True has
            # ~1e-3 relative error, per review correctness note).
            wav_ref[b, :, sl] = (acc * pl.reciprocal(l, approx=False)
                                 ).astype(wav_ref.dtype)
        return carry

    lax.fori_loop(0, Bb, batch_body, 0)

    # ---- output projection over the whole (Bb*T, D) block ------------------
    wav2 = wav_ref[...].reshape(Bb * T, D)                   # model dtype
    out = jnp.dot(wav2, wproj_ref[...],
                  preferred_element_type=jnp.float32) + bproj_ref[...]
    out_ref[...] = out.reshape(Bb, T, D).astype(out_ref.dtype)


def _pick_block_b(B, max_block=8):
    """Largest divisor of B (<= max_block) that still leaves >= 2 grid steps
    (keeps both v7x TensorCores fed); falls back to 1."""
    best = 1
    for bb in range(1, min(B, max_block) + 1):
        if B % bb == 0 and (B // bb >= 2 or B == 1):
            best = bb
    return best


def _vmem_limit_bytes():
    """~75% of physical VMEM: 48 MiB on v7x (64 MiB phys), 96 MiB on v5e/v6e
    (128 MiB phys).  Conservative v7x-sized fallback if the query fails."""
    try:
        cap = int(pltpu.get_tpu_info().vmem_capacity_bytes)
    except Exception:
        cap = 64 * 1024 * 1024
    return min((cap * 3) // 4, 100 * 1024 * 1024)


def attention_forward(x, wqkv, bqkv, wproj, bproj, n_heads, *,
                      block_b=None, split_heads=True):
    B, T, D = x.shape
    HD = D // n_heads
    scale = HD ** (-0.5)
    if block_b is None:
        block_b = _pick_block_b(B)
    assert B % block_b == 0

    kernel = functools.partial(_attention_kernel, T=T, D=D, H=n_heads, HD=HD,
                               Bb=block_b, scale=scale)

    out_shapes = (
        jax.ShapeDtypeStruct((B, T, D), x.dtype),   # projected output
        jax.ShapeDtypeStruct((B, T, D), x.dtype),   # q slab (lane-dense)
        jax.ShapeDtypeStruct((B, T, D), x.dtype),   # k slab (lane-dense)
        jax.ShapeDtypeStruct((B, T, D), x.dtype),   # v slab (lane-dense)
    )

    def run(single_buffer_weights):
        # Grid-invariant weights/biases: single-buffer them (constant
        # index_map -> double buffering only burns VMEM, never hides a DMA).
        wkw = ({'pipeline_mode': pl.Buffered(1)}
               if single_buffer_weights else {})
        xo_spec = lambda: pl.BlockSpec((block_b, T, D), lambda b: (b, 0, 0))
        grid_spec = pltpu.PrefetchScalarGridSpec(
            num_scalar_prefetch=0,
            grid=(B // block_b,),
            in_specs=[
                xo_spec(),                                              # x
                pl.BlockSpec((D, 3 * D), lambda b: (0, 0), **wkw),      # Wqkv
                pl.BlockSpec((1, 3 * D), lambda b: (0, 0), **wkw),      # bqkv
                pl.BlockSpec((D, D), lambda b: (0, 0), **wkw),          # Wproj
                pl.BlockSpec((1, D), lambda b: (0, 0), **wkw),          # bproj
            ],
            out_specs=[xo_spec(), xo_spec(), xo_spec(), xo_spec()],
            scratch_shapes=[pltpu.VMEM((block_b, T, D), x.dtype)],      # wav
        )
        return pl.pallas_call(
            kernel,
            out_shape=out_shapes,
            grid_spec=grid_spec,
            compiler_params=pltpu.CompilerParams(
                dimension_semantics=("parallel",),
                vmem_limit_bytes=_vmem_limit_bytes(),
            ),
        )(x, wqkv, bqkv, wproj, bproj)

    try:
        out, q_slab, k_slab, v_slab = run(True)
    except Exception:
        # pl.Buffered(1) not accepted by this jax/Mosaic build -> plain specs.
        out, q_slab, k_slab, v_slab = run(False)

    if not split_heads:
        # Lane-dense (B, T, D) q/k/v: skips ~6*B*T*D*itemsize bytes of HBM
        # transpose traffic when downstream can consume this layout.
        return out, q_slab, k_slab, v_slab

    # Head split in the wrapper (layout plumbing): (B,T,D) -> (B,H,T,HD),
    # matching the PyTorch reshape/permute.
    q = q_slab.reshape(B, T, n_heads, HD).transpose(0, 2, 1, 3)
    k = k_slab.reshape(B, T, n_heads, HD).transpose(0, 2, 1, 3)
    v = v_slab.reshape(B, T, n_heads, HD).transpose(0, 2, 1, 3)
    return out, q, k, v


def attention_reference(x, wqkv, bqkv, wproj, bproj, n_heads):
    """Pure-JAX reference mirroring the PyTorch forward exactly."""
    B, T, D = x.shape
    HD = D // n_heads
    scale = HD ** (-0.5)
    qkv = jnp.einsum('btd,de->bte', x, wqkv) + bqkv[0]
    qkv = qkv.reshape(B, T, 3, n_heads, HD).transpose(2, 0, 3, 1, 4)
    q, k, v = qkv[0], qkv[1], qkv[2]                      # (B, H, T, HD)
    dp = jnp.einsum('bhtd,bhsd->bhts', q, k) * scale
    attn = jax.nn.softmax(dp, axis=-1)
    wav = jnp.einsum('bhts,bhsd->bhtd', attn, v)
    wav = wav.transpose(0, 2, 1, 3).reshape(B, T, D)
    out = jnp.einsum('btd,de->bte', wav, wproj) + bproj[0]
    return out, q, k, v


if __name__ == "__main__":
    B, T, D, H = 2, 8, 32, 4   # batch, tokens(+cls), dim, heads

    key = jax.random.PRNGKey(0)
    kx, kwq, kbq, kwp, kbp = jax.random.split(key, 5)

    x = jax.random.normal(kx, (B, T, D), dtype=jnp.float32)

    # deterministic parameter init (nn.Linear-style small uniform)
    lim = 1.0 / (D ** 0.5)
    wqkv = jax.random.uniform(kwq, (D, 3 * D), jnp.float32, -lim, lim)
    bqkv = jax.random.uniform(kbq, (1, 3 * D), jnp.float32, -lim, lim)
    wproj = jax.random.uniform(kwp, (D, D), jnp.float32, -lim, lim)
    bproj = jax.random.uniform(kbp, (1, D), jnp.float32, -lim, lim)

    out, q, k, v = attention_forward(x, wqkv, bqkv, wproj, bproj, H)
    jax.block_until_ready((out, q, k, v))

    ro, rq, rk, rv = attention_reference(x, wqkv, bqkv, wproj, bproj, H)
    assert jnp.allclose(out, ro, atol=1e-4, rtol=1e-4)
    assert jnp.allclose(q, rq, atol=1e-5, rtol=1e-5)
    assert jnp.allclose(k, rk, atol=1e-5, rtol=1e-5)
    assert jnp.allclose(v, rv, atol=1e-5, rtol=1e-5)

    print("KERNEL_OK")
</pallas_src>

<mosaic_0001>
module attributes {stable_mosaic.version = 11 : i64} {
  func.func @_attention_kernel(%arg0: i32, %arg1: memref<1x8x32xf32, #tpu.memory_space<vmem>>, %arg2: memref<32x96xf32, #tpu.memory_space<vmem>>, %arg3: memref<1x96xf32, #tpu.memory_space<vmem>>, %arg4: memref<32x32xf32, #tpu.memory_space<vmem>>, %arg5: memref<1x32xf32, #tpu.memory_space<vmem>>, %arg6: memref<1x8x32xf32, #tpu.memory_space<vmem>>, %arg7: memref<1x8x32xf32, #tpu.memory_space<vmem>>, %arg8: memref<1x8x32xf32, #tpu.memory_space<vmem>>, %arg9: memref<1x8x32xf32, #tpu.memory_space<vmem>>, %arg10: memref<1x8x32xf32, #tpu.memory_space<vmem>>) attributes {dimension_semantics = [#tpu.dimension_semantics<parallel>], iteration_bounds = array<i64: 2>, scalar_prefetch = 0 : i64, scratch_operands = 1 : i64, tpu.core_type = #tpu.core_type<tc>, window_params = [{transform_indices = @transform_0, window_bounds = array<i64: 1, 8, 32>}, {pipeline_mode = #tpu.pipeline_mode<synchronous>, transform_indices = @transform_1, window_bounds = array<i64: 32, 96>}, {pipeline_mode = #tpu.pipeline_mode<synchronous>, transform_indices = @transform_2, window_bounds = array<i64: 1, 96>}, {pipeline_mode = #tpu.pipeline_mode<synchronous>, transform_indices = @transform_3, window_bounds = array<i64: 32, 32>}, {pipeline_mode = #tpu.pipeline_mode<synchronous>, transform_indices = @transform_4, window_bounds = array<i64: 1, 32>}, {transform_indices = @transform_5, window_bounds = array<i64: 1, 8, 32>}, {transform_indices = @transform_6, window_bounds = array<i64: 1, 8, 32>}, {transform_indices = @transform_7, window_bounds = array<i64: 1, 8, 32>}, {transform_indices = @transform_8, window_bounds = array<i64: 1, 8, 32>}]} {
    %c0 = arith.constant 0 : index
    %c0_0 = arith.constant 0 : index
    %c0_1 = arith.constant 0 : index
    %0 = vector.load %arg1[%c0, %c0_0, %c0_1] : memref<1x8x32xf32, #tpu.memory_space<vmem>>, vector<1x8x32xf32>
    %1 = vector.shape_cast %0 : vector<1x8x32xf32> to vector<8x32xf32>
    %c0_2 = arith.constant 0 : index
    %c0_3 = arith.constant 0 : index
    %2 = vector.load %arg2[%c0_2, %c0_3] : memref<32x96xf32, #tpu.memory_space<vmem>>, vector<32x96xf32>
    %cst = arith.constant dense<0.000000e+00> : vector<8x96xf32>
    %3 = tpu.matmul %1, %2, %cst {dimension_numbers = #tpu.dot_dimension_numbers<[1], [0], [0], [1], [0, 0, 1, 1], [], []>} : vector<8x32xf32>, vector<32x96xf32>, vector<8x96xf32> -> vector<8x96xf32>
    %c0_4 = arith.constant 0 : index
    %c0_5 = arith.constant 0 : index
    %4 = vector.load %arg3[%c0_4, %c0_5] : memref<1x96xf32, #tpu.memory_space<vmem>>, vector<1x96xf32>
    %5 = vector.broadcast %4 : vector<1x96xf32> to vector<8x96xf32>
    %6 = arith.addf %3, %5 : vector<8x96xf32>
    %7 = vector.extract_strided_slice %6 {offsets = [0, 0], sizes = [8, 32], strides = [1, 1]} : vector<8x96xf32> to vector<8x32xf32>
    %8 = vector.extract_strided_slice %6 {offsets = [0, 32], sizes = [8, 32], strides = [1, 1]} : vector<8x96xf32> to vector<8x32xf32>
    %9 = vector.extract_strided_slice %6 {offsets = [0, 64], sizes = [8, 32], strides = [1, 1]} : vector<8x96xf32> to vector<8x32xf32>
    %10 = vector.shape_cast %7 : vector<8x32xf32> to vector<1x8x32xf32>
    %c0_6 = arith.constant 0 : index
    %c0_7 = arith.constant 0 : index
    %c0_8 = arith.constant 0 : index
    %11 = vector.load %arg7[%c0_6, %c0_7, %c0_8] : memref<1x8x32xf32, #tpu.memory_space<vmem>>, vector<1x8x32xf32>
    tpu.vector_store %arg7[%c0_6, %c0_7, %c0_8], %10 {strides = array<i32>} : memref<1x8x32xf32, #tpu.memory_space<vmem>>, vector<1x8x32xf32>,
    %12 = vector.shape_cast %8 : vector<8x32xf32> to vector<1x8x32xf32>
    %c0_9 = arith.constant 0 : index
    %c0_10 = arith.constant 0 : index
    %c0_11 = arith.constant 0 : index
    %13 = vector.load %arg8[%c0_9, %c0_10, %c0_11] : memref<1x8x32xf32, #tpu.memory_space<vmem>>, vector<1x8x32xf32>
    tpu.vector_store %arg8[%c0_9, %c0_10, %c0_11], %12 {strides = array<i32>} : memref<1x8x32xf32, #tpu.memory_space<vmem>>, vector<1x8x32xf32>,
    %14 = vector.shape_cast %9 : vector<8x32xf32> to vector<1x8x32xf32>
    %c0_12 = arith.constant 0 : index
    %c0_13 = arith.constant 0 : index
    %c0_14 = arith.constant 0 : index
    %15 = vector.load %arg9[%c0_12, %c0_13, %c0_14] : memref<1x8x32xf32, #tpu.memory_space<vmem>>, vector<1x8x32xf32>
    tpu.vector_store %arg9[%c0_12, %c0_13, %c0_14], %14 {strides = array<i32>} : memref<1x8x32xf32, #tpu.memory_space<vmem>>, vector<1x8x32xf32>,
    %c0_i32 = arith.constant 0 : i32
    %16 = arith.index_cast %c0_i32 : i32 to index
    %c0_15 = arith.constant 0 : index
    %c0_16 = arith.constant 0 : index
    %17 = vector.load %arg7[%16, %c0_15, %c0_16] : memref<1x8x32xf32, #tpu.memory_space<vmem>>, vector<1x8x32xf32>
    %18 = vector.shape_cast %17 : vector<1x8x32xf32> to vector<8x32xf32>
    %cst_17 = arith.constant 0.353553385 : f32
    %19 = vector.broadcast %cst_17 : f32 to vector<8x32xf32>
    %20 = arith.mulf %18, %19 : vector<8x32xf32>
    %21 = arith.index_cast %c0_i32 : i32 to index
    %c0_18 = arith.constant 0 : index
    %c0_19 = arith.constant 0 : index
    %22 = vector.load %arg8[%21, %c0_18, %c0_19] : memref<1x8x32xf32, #tpu.memory_space<vmem>>, vector<1x8x32xf32>
    %23 = vector.shape_cast %22 : vector<1x8x32xf32> to vector<8x32xf32>
    %24 = arith.index_cast %c0_i32 : i32 to index
    %c0_20 = arith.constant 0 : index
    %c0_21 = arith.constant 0 : index
    %25 = vector.load %arg9[%24, %c0_20, %c0_21] : memref<1x8x32xf32, #tpu.memory_space<vmem>>, vector<1x8x32xf32>
    %26 = vector.shape_cast %25 : vector<1x8x32xf32> to vector<8x32xf32>
    %27 = vector.extract_strided_slice %20 {offsets = [0, 0], sizes = [8, 8], strides = [1, 1]} : vector<8x32xf32> to vector<8x8xf32>
    %28 = vector.extract_strided_slice %23 {offsets = [0, 0], sizes = [8, 8], strides = [1, 1]} : vector<8x32xf32> to vector<8x8xf32>
    %29 = vector.extract_strided_slice %26 {offsets = [0, 0], sizes = [8, 8], strides = [1, 1]} : vector<8x32xf32> to vector<8x8xf32>
    %cst_22 = arith.constant dense<0.000000e+00> : vector<8x8xf32>
    %30 = tpu.matmul %27, %28, %cst_22 {dimension_numbers = #tpu.dot_dimension_numbers<[1], [1], [0], [0], [0, 0, 1, 0], [], []>} : vector<8x8xf32>, vector<8x8xf32>, vector<8x8xf32> -> vector<8x8xf32>
    %cst_23 = arith.constant dense<0xFF800000> : vector<8xf32>
    %31 = vector.multi_reduction <maximumf>, %30, %cst_23 [1] : vector<8x8xf32> to vector<8xf32>
    %32 = vector.shape_cast %31 : vector<8xf32> to vector<8x1xf32>
    %33 = vector.broadcast %32 : vector<8x1xf32> to vector<8x8xf32>
    %34 = arith.subf %30, %33 : vector<8x8xf32>
    %35 = math.exp %34 : vector<8x8xf32>
    %cst_24 = arith.constant dense<0.000000e+00> : vector<8xf32>
    %36 = vector.multi_reduction <add>, %35, %cst_24 [1] : vector<8x8xf32> to vector<8xf32>
    %37 = vector.shape_cast %36 : vector<8xf32> to vector<8x1xf32>
    %cst_25 = arith.constant dense<0.000000e+00> : vector<8x8xf32>
    %38 = tpu.matmul %35, %29, %cst_25 {dimension_numbers = #tpu.dot_dimension_numbers<[1], [0], [0], [1], [0, 0, 1, 1], [], []>} : vector<8x8xf32>, vector<8x8xf32>, vector<8x8xf32> -> vector<8x8xf32>
    %39 = tpu.reciprocal %37 : vector<8x1xf32> -> vector<8x1xf32>
    %40 = vector.broadcast %39 : vector<8x1xf32> to vector<8x8xf32>
    %41 = arith.mulf %38, %40 : vector<8x8xf32>
    %42 = arith.index_cast %c0_i32 : i32 to index
    %c0_26 = arith.constant 0 : index
    %c0_27 = arith.constant 0 : index
    %43 = vector.load %arg10[%42, %c0_26, %c0_27] : memref<1x8x32xf32, #tpu.memory_space<vmem>>, vector<1x8x8xf32>
    %44 = vector.shape_cast %43 : vector<1x8x8xf32> to vector<8x8xf32>
    %45 = vector.shape_cast %41 : vector<8x8xf32> to vector<1x8x8xf32>
    tpu.vector_store %arg10[%42, %c0_26, %c0_27], %45 {strides = array<i32>} : memref<1x8x32xf32, #tpu.memory_space<vmem>>, vector<1x8x8xf32>,
    %46 = vector.extract_strided_slice %20 {offsets = [0, 8], sizes = [8, 8], strides = [1, 1]} : vector<8x32xf32> to vector<8x8xf32>
    %47 = vector.extract_strided_slice %23 {offsets = [0, 8], sizes = [8, 8], strides = [1, 1]} : vector<8x32xf32> to vector<8x8xf32>
    %48 = vector.extract_strided_slice %26 {offsets = [0, 8], sizes = [8, 8], strides = [1, 1]} : vector<8x32xf32> to vector<8x8xf32>
    %cst_28 = arith.constant dense<0.000000e+00> : vector<8x8xf32>
    %49 = tpu.matmul %46, %47, %cst_28 {dimension_numbers = #tpu.dot_dimension_numbers<[1], [1], [0], [0], [0, 0, 1, 0], [], []>} : vector<8x8xf32>, vector<8x8xf32>, vector<8x8xf32> -> vector<8x8xf32>
    %cst_29 = arith.constant dense<0xFF800000> : vector<8xf32>
    %50 = vector.multi_reduction <maximumf>, %49, %cst_29 [1] : vector<8x8xf32> to vector<8xf32>
    %51 = vector.shape_cast %50 : vector<8xf32> to vector<8x1xf32>
    %52 = vector.broadcast %51 : vector<8x1xf32> to vector<8x8xf32>
    %53 = arith.subf %49, %52 : vector<8x8xf32>
    %54 = math.exp %53 : vector<8x8xf32>
    %cst_30 = arith.constant dense<0.000000e+00> : vector<8xf32>
    %55 = vector.multi_reduction <add>, %54, %cst_30 [1] : vector<8x8xf32> to vector<8xf32>
    %56 = vector.shape_cast %55 : vector<8xf32> to vector<8x1xf32>
    %cst_31 = arith.constant dense<0.000000e+00> : vector<8x8xf32>
    %57 = tpu.matmul %54, %48, %cst_31 {dimension_numbers = #tpu.dot_dimension_numbers<[1], [0], [0], [1], [0, 0, 1, 1], [], []>} : vector<8x8xf32>, vector<8x8xf32>, vector<8x8xf32> -> vector<8x8xf32>
    %58 = tpu.reciprocal %56 : vector<8x1xf32> -> vector<8x1xf32>
    %59 = vector.broadcast %58 : vector<8x1xf32> to vector<8x8xf32>
    %60 = arith.mulf %57, %59 : vector<8x8xf32>
    %61 = arith.index_cast %c0_i32 : i32 to index
    %c0_32 = arith.constant 0 : index
    %c8 = arith.constant 8 : index
    %62 = vector.load %arg10[%61, %c0_32, %c8] : memref<1x8x32xf32, #tpu.memory_space<vmem>>, vector<1x8x8xf32>
    %63 = vector.shape_cast %62 : vector<1x8x8xf32> to vector<8x8xf32>
    %64 = vector.shape_cast %60 : vector<8x8xf32> to vector<1x8x8xf32>
    tpu.vector_store %arg10[%61, %c0_32, %c8], %64 {strides = array<i32>} : memref<1x8x32xf32, #tpu.memory_space<vmem>>, vector<1x8x8xf32>,
    %65 = vector.extract_strided_slice %20 {offsets = [0, 16], sizes = [8, 8], strides = [1, 1]} : vector<8x32xf32> to vector<8x8xf32>
    %66 = vector.extract_strided_slice %23 {offsets = [0, 16], sizes = [8, 8], strides = [1, 1]} : vector<8x32xf32> to vector<8x8xf32>
    %67 = vector.extract_strided_slice %26 {offsets = [0, 16], sizes = [8, 8], strides = [1, 1]} : vector<8x32xf32> to vector<8x8xf32>
    %cst_33 = arith.constant dense<0.000000e+00> : vector<8x8xf32>
    %68 = tpu.matmul %65, %66, %cst_33 {dimension_numbers = #tpu.dot_dimension_numbers<[1], [1], [0], [0], [0, 0, 1, 0], [], []>} : vector<8x8xf32>, vector<8x8xf32>, vector<8x8xf32> -> vector<8x8xf32>
    %cst_34 = arith.constant dense<0xFF800000> : vector<8xf32>
    %69 = vector.multi_reduction <maximumf>, %68, %cst_34 [1] : vector<8x8xf32> to vector<8xf32>
    %70 = vector.shape_cast %69 : vector<8xf32> to vector<8x1xf32>
    %71 = vector.broadcast %70 : vector<8x1xf32> to vector<8x8xf32>
    %72 = arith.subf %68, %71 : vector<8x8xf32>
    %73 = math.exp %72 : vector<8x8xf32>
    %cst_35 = arith.constant dense<0.000000e+00> : vector<8xf32>
    %74 = vector.multi_reduction <add>, %73, %cst_35 [1] : vector<8x8xf32> to vector<8xf32>
    %75 = vector.shape_cast %74 : vector<8xf32> to vector<8x1xf32>
    %cst_36 = arith.constant dense<0.000000e+00> : vector<8x8xf32>
    %76 = tpu.matmul %73, %67, %cst_36 {dimension_numbers = #tpu.dot_dimension_numbers<[1], [0], [0], [1], [0, 0, 1, 1], [], []>} : vector<8x8xf32>, vector<8x8xf32>, vector<8x8xf32> -> vector<8x8xf32>
    %77 = tpu.reciprocal %75 : vector<8x1xf32> -> vector<8x1xf32>
    %78 = vector.broadcast %77 : vector<8x1xf32> to vector<8x8xf32>
    %79 = arith.mulf %76, %78 : vector<8x8xf32>
    %80 = arith.index_cast %c0_i32 : i32 to index
    %c0_37 = arith.constant 0 : index
    %c16 = arith.constant 16 : index
    %81 = vector.load %arg10[%80, %c0_37, %c16] : memref<1x8x32xf32, #tpu.memory_space<vmem>>, vector<1x8x8xf32>
    %82 = vector.shape_cast %81 : vector<1x8x8xf32> to vector<8x8xf32>
    %83 = vector.shape_cast %79 : vector<8x8xf32> to vector<1x8x8xf32>
    tpu.vector_store %arg10[%80, %c0_37, %c16], %83 {strides = array<i32>} : memref<1x8x32xf32, #tpu.memory_space<vmem>>, vector<1x8x8xf32>,
    %84 = vector.extract_strided_slice %20 {offsets = [0, 24], sizes = [8, 8], strides = [1, 1]} : vector<8x32xf32> to vector<8x8xf32>
    %85 = vector.extract_strided_slice %23 {offsets = [0, 24], sizes = [8, 8], strides = [1, 1]} : vector<8x32xf32> to vector<8x8xf32>
    %86 = vector.extract_strided_slice %26 {offsets = [0, 24], sizes = [8, 8], strides = [1, 1]} : vector<8x32xf32> to vector<8x8xf32>
    %cst_38 = arith.constant dense<0.000000e+00> : vector<8x8xf32>
    %87 = tpu.matmul %84, %85, %cst_38 {dimension_numbers = #tpu.dot_dimension_numbers<[1], [1], [0], [0], [0, 0, 1, 0], [], []>} : vector<8x8xf32>, vector<8x8xf32>, vector<8x8xf32> -> vector<8x8xf32>
    %cst_39 = arith.constant dense<0xFF800000> : vector<8xf32>
    %88 = vector.multi_reduction <maximumf>, %87, %cst_39 [1] : vector<8x8xf32> to vector<8xf32>
    %89 = vector.shape_cast %88 : vector<8xf32> to vector<8x1xf32>
    %90 = vector.broadcast %89 : vector<8x1xf32> to vector<8x8xf32>
    %91 = arith.subf %87, %90 : vector<8x8xf32>
    %92 = math.exp %91 : vector<8x8xf32>
    %cst_40 = arith.constant dense<0.000000e+00> : vector<8xf32>
    %93 = vector.multi_reduction <add>, %92, %cst_40 [1] : vector<8x8xf32> to vector<8xf32>
    %94 = vector.shape_cast %93 : vector<8xf32> to vector<8x1xf32>
    %cst_41 = arith.constant dense<0.000000e+00> : vector<8x8xf32>
    %95 = tpu.matmul %92, %86, %cst_41 {dimension_numbers = #tpu.dot_dimension_numbers<[1], [0], [0], [1], [0, 0, 1, 1], [], []>} : vector<8x8xf32>, vector<8x8xf32>, vector<8x8xf32> -> vector<8x8xf32>
    %96 = tpu.reciprocal %94 : vector<8x1xf32> -> vector<8x1xf32>
    %97 = vector.broadcast %96 : vector<8x1xf32> to vector<8x8xf32>
    %98 = arith.mulf %95, %97 : vector<8x8xf32>
    %99 = arith.index_cast %c0_i32 : i32 to index
    %c0_42 = arith.constant 0 : index
    %c24 = arith.constant 24 : index
    %100 = vector.load %arg10[%99, %c0_42, %c24] : memref<1x8x32xf32, #tpu.memory_space<vmem>>, vector<1x8x8xf32>
    %101 = vector.shape_cast %100 : vector<1x8x8xf32> to vector<8x8xf32>
    %102 = vector.shape_cast %98 : vector<8x8xf32> to vector<1x8x8xf32>
    tpu.vector_store %arg10[%99, %c0_42, %c24], %102 {strides = array<i32>} : memref<1x8x32xf32, #tpu.memory_space<vmem>>, vector<1x8x8xf32>,
    %c1_i32 = arith.constant 1 : i32
    %c0_43 = arith.constant 0 : index
    %c0_44 = arith.constant 0 : index
    %c0_45 = arith.constant 0 : index
    %103 = vector.load %arg10[%c0_43, %c0_44, %c0_45] : memref<1x8x32xf32, #tpu.memory_space<vmem>>, vector<1x8x32xf32>
    %104 = vector.shape_cast %103 : vector<1x8x32xf32> to vector<8x32xf32>
    %c0_46 = arith.constant 0 : index
    %c0_47 = arith.constant 0 : index
    %105 = vector.load %arg4[%c0_46, %c0_47] : memref<32x32xf32, #tpu.memory_space<vmem>>, vector<32x32xf32>
    %cst_48 = arith.constant dense<0.000000e+00> : vector<8x32xf32>
    %106 = tpu.matmul %104, %105, %cst_48 {dimension_numbers = #tpu.dot_dimension_numbers<[1], [0], [0], [1], [0, 0, 1, 1], [], []>} : vector<8x32xf32>, vector<32x32xf32>, vector<8x32xf32> -> vector<8x32xf32>
    %c0_49 = arith.constant 0 : index
    %c0_50 = arith.constant 0 : index
    %107 = vector.load %arg5[%c0_49, %c0_50] : memref<1x32xf32, #tpu.memory_space<vmem>>, vector<1x32xf32>
    %108 = vector.broadcast %107 : vector<1x32xf32> to vector<8x32xf32>
    %109 = arith.addf %106, %108 : vector<8x32xf32>
    %110 = vector.shape_cast %109 : vector<8x32xf32> to vector<1x8x32xf32>
    %c0_51 = arith.constant 0 : index
    %c0_52 = arith.constant 0 : index
    %c0_53 = arith.constant 0 : index
    %111 = vector.load %arg6[%c0_51, %c0_52, %c0_53] : memref<1x8x32xf32, #tpu.memory_space<vmem>>, vector<1x8x32xf32>
    tpu.vector_store %arg6[%c0_51, %c0_52, %c0_53], %110 {strides = array<i32>} : memref<1x8x32xf32, #tpu.memory_space<vmem>>, vector<1x8x32xf32>,
    return
  }
  func.func @transform_0(%arg0: i32) -> (i32, i32, i32) {
    %c0_i32 = arith.constant 0 : i32
    %c0_i32_0 = arith.constant 0 : i32
    %c0_i32_1 = arith.constant 0 : i32
    return %arg0, %c0_i32, %c0_i32_0 : i32, i32, i32
  }
  func.func @transform_1(%arg0: i32) -> (i32, i32) {
    %c0_i32 = arith.constant 0 : i32
    %c0_i32_0 = arith.constant 0 : i32
    %c0_i32_1 = arith.constant 0 : i32
    return %c0_i32, %c0_i32_0 : i32, i32
  }
  func.func @transform_2(%arg0: i32) -> (i32, i32) {
    %c0_i32 = arith.constant 0 : i32
    %c0_i32_0 = arith.constant 0 : i32
    %c0_i32_1 = arith.constant 0 : i32
    return %c0_i32, %c0_i32_0 : i32, i32
  }
  func.func @transform_3(%arg0: i32) -> (i32, i32) {
    %c0_i32 = arith.constant 0 : i32
    %c0_i32_0 = arith.constant 0 : i32
    %c0_i32_1 = arith.constant 0 : i32
    return %c0_i32, %c0_i32_0 : i32, i32
  }
  func.func @transform_4(%arg0: i32) -> (i32, i32) {
    %c0_i32 = arith.constant 0 : i32
    %c0_i32_0 = arith.constant 0 : i32
    %c0_i32_1 = arith.constant 0 : i32
    return %c0_i32, %c0_i32_0 : i32, i32
  }
  func.func @transform_5(%arg0: i32) -> (i32, i32, i32) {
    %c0_i32 = arith.constant 0 : i32
    %c0_i32_0 = arith.constant 0 : i32
    %c0_i32_1 = arith.constant 0 : i32
    return %arg0, %c0_i32, %c0_i32_0 : i32, i32, i32
  }
  func.func @transform_6(%arg0: i32) -> (i32, i32, i32) {
    %c0_i32 = arith.constant 0 : i32
    %c0_i32_0 = arith.constant 0 : i32
    %c0_i32_1 = arith.constant 0 : i32
    return %arg0, %c0_i32, %c0_i32_0 : i32, i32, i32
  }
  func.func @transform_7(%arg0: i32) -> (i32, i32, i32) {
    %c0_i32 = arith.constant 0 : i32
    %c0_i32_0 = arith.constant 0 : i32
    %c0_i32_1 = arith.constant 0 : i32
    return %arg0, %c0_i32, %c0_i32_0 : i32, i32, i32
  }
  func.func @transform_8(%arg0: i32) -> (i32, i32, i32) {
    %c0_i32 = arith.constant 0 : i32
    %c0_i32_0 = arith.constant 0 : i32
    %c0_i32_1 = arith.constant 0 : i32
    return %arg0, %c0_i32, %c0_i32_0 : i32, i32, i32
  }
}

module attributes {stable_mosaic.version = 11 : i64} {
  func.func @_attention_kernel(%arg0: i32, %arg1: memref<1x8x32xf32, #tpu.memory_space<vmem>>, %arg2: memref<32x96xf32, #tpu.memory_space<vmem>>, %arg3: memref<1x96xf32, #tpu.memory_space<vmem>>, %arg4: memref<32x32xf32, #tpu.memory_space<vmem>>, %arg5: memref<1x32xf32, #tpu.memory_space<vmem>>, %arg6: memref<1x8x32xf32, #tpu.memory_space<vmem>>, %arg7: memref<1x8x32xf32, #tpu.memory_space<vmem>>, %arg8: memref<1x8x32xf32, #tpu.memory_space<vmem>>, %arg9: memref<1x8x32xf32, #tpu.memory_space<vmem>>, %arg10: memref<1x8x32xf32, #tpu.memory_space<vmem>>) attributes {dimension_semantics = [#tpu.dimension_semantics<parallel>], iteration_bounds = array<i64: 2>, scalar_prefetch = 0 : i64, scratch_operands = 1 : i64, tpu.core_type = #tpu.core_type<tc>, window_params = [{transform_indices = @transform_0, window_bounds = array<i64: 1, 8, 32>}, {pipeline_mode = #tpu.pipeline_mode<synchronous>, transform_indices = @transform_1, window_bounds = array<i64: 32, 96>}, {pipeline_mode = #tpu.pipeline_mode<synchronous>, transform_indices = @transform_2, window_bounds = array<i64: 1, 96>}, {pipeline_mode = #tpu.pipeline_mode<synchronous>, transform_indices = @transform_3, window_bounds = array<i64: 32, 32>}, {pipeline_mode = #tpu.pipeline_mode<synchronous>, transform_indices = @transform_4, window_bounds = array<i64: 1, 32>}, {transform_indices = @transform_5, window_bounds = array<i64: 1, 8, 32>}, {transform_indices = @transform_6, window_bounds = array<i64: 1, 8, 32>}, {transform_indices = @transform_7, window_bounds = array<i64: 1, 8, 32>}, {transform_indices = @transform_8, window_bounds = array<i64: 1, 8, 32>}]} {
    %c0 = arith.constant 0 : index
    %c0_0 = arith.constant 0 : index
    %c0_1 = arith.constant 0 : index
    %0 = vector.load %arg1[%c0, %c0_0, %c0_1] : memref<1x8x32xf32, #tpu.memory_space<vmem>>, vector<1x8x32xf32>
    %1 = vector.shape_cast %0 : vector<1x8x32xf32> to vector<8x32xf32>
    %c0_2 = arith.constant 0 : index
    %c0_3 = arith.constant 0 : index
    %2 = vector.load %arg2[%c0_2, %c0_3] : memref<32x96xf32, #tpu.memory_space<vmem>>, vector<32x96xf32>
    %cst = arith.constant dense<0.000000e+00> : vector<8x96xf32>
    %3 = tpu.matmul %1, %2, %cst {dimension_numbers = #tpu.dot_dimension_numbers<[1], [0], [0], [1], [0, 0, 1, 1], [], []>} : vector<8x32xf32>, vector<32x96xf32>, vector<8x96xf32> -> vector<8x96xf32>
    %c0_4 = arith.constant 0 : index
    %c0_5 = arith.constant 0 : index
    %4 = vector.load %arg3[%c0_4, %c0_5] : memref<1x96xf32, #tpu.memory_space<vmem>>, vector<1x96xf32>
    %5 = vector.broadcast %4 : vector<1x96xf32> to vector<8x96xf32>
    %6 = arith.addf %3, %5 : vector<8x96xf32>
    %7 = vector.extract_strided_slice %6 {offsets = [0, 0], sizes = [8, 32], strides = [1, 1]} : vector<8x96xf32> to vector<8x32xf32>
    %8 = vector.extract_strided_slice %6 {offsets = [0, 32], sizes = [8, 32], strides = [1, 1]} : vector<8x96xf32> to vector<8x32xf32>
    %9 = vector.extract_strided_slice %6 {offsets = [0, 64], sizes = [8, 32], strides = [1, 1]} : vector<8x96xf32> to vector<8x32xf32>
    %10 = vector.shape_cast %7 : vector<8x32xf32> to vector<1x8x32xf32>
    %c0_6 = arith.constant 0 : index
    %c0_7 = arith.constant 0 : index
    %c0_8 = arith.constant 0 : index
    %11 = vector.load %arg7[%c0_6, %c0_7, %c0_8] : memref<1x8x32xf32, #tpu.memory_space<vmem>>, vector<1x8x32xf32>
    tpu.vector_store %arg7[%c0_6, %c0_7, %c0_8], %10 {strides = array<i32>} : memref<1x8x32xf32, #tpu.memory_space<vmem>>, vector<1x8x32xf32>,
    %12 = vector.shape_cast %8 : vector<8x32xf32> to vector<1x8x32xf32>
    %c0_9 = arith.constant 0 : index
    %c0_10 = arith.constant 0 : index
    %c0_11 = arith.constant 0 : index
    %13 = vector.load %arg8[%c0_9, %c0_10, %c0_11] : memref<1x8x32xf32, #tpu.memory_space<vmem>>, vector<1x8x32xf32>
    tpu.vector_store %arg8[%c0_9, %c0_10, %c0_11], %12 {strides = array<i32>} : memref<1x8x32xf32, #tpu.memory_space<vmem>>, vector<1x8x32xf32>,
    %14 = vector.shape_cast %9 : vector<8x32xf32> to vector<1x8x32xf32>
    %c0_12 = arith.constant 0 : index
    %c0_13 = arith.constant 0 : index
    %c0_14 = arith.constant 0 : index
    %15 = vector.load %arg9[%c0_12, %c0_13, %c0_14] : memref<1x8x32xf32, #tpu.memory_space<vmem>>, vector<1x8x32xf32>
    tpu.vector_store %arg9[%c0_12, %c0_13, %c0_14], %14 {strides = array<i32>} : memref<1x8x32xf32, #tpu.memory_space<vmem>>, vector<1x8x32xf32>,
    %c0_i32 = arith.constant 0 : i32
    %16 = arith.index_cast %c0_i32 : i32 to index
    %c0_15 = arith.constant 0 : index
    %c0_16 = arith.constant 0 : index
    %17 = vector.load %arg7[%16, %c0_15, %c0_16] : memref<1x8x32xf32, #tpu.memory_space<vmem>>, vector<1x8x32xf32>
    %18 = vector.shape_cast %17 : vector<1x8x32xf32> to vector<8x32xf32>
    %cst_17 = arith.constant 0.353553385 : f32
    %19 = vector.broadcast %cst_17 : f32 to vector<8x32xf32>
    %20 = arith.mulf %18, %19 : vector<8x32xf32>
    %21 = arith.index_cast %c0_i32 : i32 to index
    %c0_18 = arith.constant 0 : index
    %c0_19 = arith.constant 0 : index
    %22 = vector.load %arg8[%21, %c0_18, %c0_19] : memref<1x8x32xf32, #tpu.memory_space<vmem>>, vector<1x8x32xf32>
    %23 = vector.shape_cast %22 : vector<1x8x32xf32> to vector<8x32xf32>
    %24 = arith.index_cast %c0_i32 : i32 to index
    %c0_20 = arith.constant 0 : index
    %c0_21 = arith.constant 0 : index
    %25 = vector.load %arg9[%24, %c0_20, %c0_21] : memref<1x8x32xf32, #tpu.memory_space<vmem>>, vector<1x8x32xf32>
    %26 = vector.shape_cast %25 : vector<1x8x32xf32> to vector<8x32xf32>
    %27 = vector.extract_strided_slice %20 {offsets = [0, 0], sizes = [8, 8], strides = [1, 1]} : vector<8x32xf32> to vector<8x8xf32>
    %28 = vector.extract_strided_slice %23 {offsets = [0, 0], sizes = [8, 8], strides = [1, 1]} : vector<8x32xf32> to vector<8x8xf32>
    %29 = vector.extract_strided_slice %26 {offsets = [0, 0], sizes = [8, 8], strides = [1, 1]} : vector<8x32xf32> to vector<8x8xf32>
    %cst_22 = arith.constant dense<0.000000e+00> : vector<8x8xf32>
    %30 = tpu.matmul %27, %28, %cst_22 {dimension_numbers = #tpu.dot_dimension_numbers<[1], [1], [0], [0], [0, 0, 1, 0], [], []>} : vector<8x8xf32>, vector<8x8xf32>, vector<8x8xf32> -> vector<8x8xf32>
    %cst_23 = arith.constant dense<0xFF800000> : vector<8xf32>
    %31 = vector.multi_reduction <maximumf>, %30, %cst_23 [1] : vector<8x8xf32> to vector<8xf32>
    %32 = vector.shape_cast %31 : vector<8xf32> to vector<8x1xf32>
    %33 = vector.broadcast %32 : vector<8x1xf32> to vector<8x8xf32>
    %34 = arith.subf %30, %33 : vector<8x8xf32>
    %35 = math.exp %34 : vector<8x8xf32>
    %cst_24 = arith.constant dense<0.000000e+00> : vector<8xf32>
    %36 = vector.multi_reduction <add>, %35, %cst_24 [1] : vector<8x8xf32> to vector<8xf32>
    %37 = vector.shape_cast %36 : vector<8xf32> to vector<8x1xf32>
    %cst_25 = arith.constant dense<0.000000e+00> : vector<8x8xf32>
    %38 = tpu.matmul %35, %29, %cst_25 {dimension_numbers = #tpu.dot_dimension_numbers<[1], [0], [0], [1], [0, 0, 1, 1], [], []>} : vector<8x8xf32>, vector<8x8xf32>, vector<8x8xf32> -> vector<8x8xf32>
    %39 = tpu.reciprocal %37 : vector<8x1xf32> -> vector<8x1xf32>
    %40 = vector.broadcast %39 : vector<8x1xf32> to vector<8x8xf32>
    %41 = arith.mulf %38, %40 : vector<8x8xf32>
    %42 = arith.index_cast %c0_i32 : i32 to index
    %c0_26 = arith.constant 0 : index
    %c0_27 = arith.constant 0 : index
    %43 = vector.load %arg10[%42, %c0_26, %c0_27] : memref<1x8x32xf32, #tpu.memory_space<vmem>>, vector<1x8x8xf32>
    %44 = vector.shape_cast %43 : vector<1x8x8xf32> to vector<8x8xf32>
    %45 = vector.shape_cast %41 : vector<8x8xf32> to vector<1x8x8xf32>
    tpu.vector_store %arg10[%42, %c0_26, %c0_27], %45 {strides = array<i32>} : memref<1x8x32xf32, #tpu.memory_space<vmem>>, vector<1x8x8xf32>,
    %46 = vector.extract_strided_slice %20 {offsets = [0, 8], sizes = [8, 8], strides = [1, 1]} : vector<8x32xf32> to vector<8x8xf32>
    %47 = vector.extract_strided_slice %23 {offsets = [0, 8], sizes = [8, 8], strides = [1, 1]} : vector<8x32xf32> to vector<8x8xf32>
    %48 = vector.extract_strided_slice %26 {offsets = [0, 8], sizes = [8, 8], strides = [1, 1]} : vector<8x32xf32> to vector<8x8xf32>
    %cst_28 = arith.constant dense<0.000000e+00> : vector<8x8xf32>
    %49 = tpu.matmul %46, %47, %cst_28 {dimension_numbers = #tpu.dot_dimension_numbers<[1], [1], [0], [0], [0, 0, 1, 0], [], []>} : vector<8x8xf32>, vector<8x8xf32>, vector<8x8xf32> -> vector<8x8xf32>
    %cst_29 = arith.constant dense<0xFF800000> : vector<8xf32>
    %50 = vector.multi_reduction <maximumf>, %49, %cst_29 [1] : vector<8x8xf32> to vector<8xf32>
    %51 = vector.shape_cast %50 : vector<8xf32> to vector<8x1xf32>
    %52 = vector.broadcast %51 : vector<8x1xf32> to vector<8x8xf32>
    %53 = arith.subf %49, %52 : vector<8x8xf32>
    %54 = math.exp %53 : vector<8x8xf32>
    %cst_30 = arith.constant dense<0.000000e+00> : vector<8xf32>
    %55 = vector.multi_reduction <add>, %54, %cst_30 [1] : vector<8x8xf32> to vector<8xf32>
    %56 = vector.shape_cast %55 : vector<8xf32> to vector<8x1xf32>
    %cst_31 = arith.constant dense<0.000000e+00> : vector<8x8xf32>
    %57 = tpu.matmul %54, %48, %cst_31 {dimension_numbers = #tpu.dot_dimension_numbers<[1], [0], [0], [1], [0, 0, 1, 1], [], []>} : vector<8x8xf32>, vector<8x8xf32>, vector<8x8xf32> -> vector<8x8xf32>
    %58 = tpu.reciprocal %56 : vector<8x1xf32> -> vector<8x1xf32>
    %59 = vector.broadcast %58 : vector<8x1xf32> to vector<8x8xf32>
    %60 = arith.mulf %57, %59 : vector<8x8xf32>
    %61 = arith.index_cast %c0_i32 : i32 to index
    %c0_32 = arith.constant 0 : index
    %c8 = arith.constant 8 : index
    %62 = vector.load %arg10[%61, %c0_32, %c8] : memref<1x8x32xf32, #tpu.memory_space<vmem>>, vector<1x8x8xf32>
    %63 = vector.shape_cast %62 : vector<1x8x8xf32> to vector<8x8xf32>
    %64 = vector.shape_cast %60 : vector<8x8xf32> to vector<1x8x8xf32>
    tpu.vector_store %arg10[%61, %c0_32, %c8], %64 {strides = array<i32>} : memref<1x8x32xf32, #tpu.memory_space<vmem>>, vector<1x8x8xf32>,
    %65 = vector.extract_strided_slice %20 {offsets = [0, 16], sizes = [8, 8], strides = [1, 1]} : vector<8x32xf32> to vector<8x8xf32>
    %66 = vector.extract_strided_slice %23 {offsets = [0, 16], sizes = [8, 8], strides = [1, 1]} : vector<8x32xf32> to vector<8x8xf32>
    %67 = vector.extract_strided_slice %26 {offsets = [0, 16], sizes = [8, 8], strides = [1, 1]} : vector<8x32xf32> to vector<8x8xf32>
    %cst_33 = arith.constant dense<0.000000e+00> : vector<8x8xf32>
    %68 = tpu.matmul %65, %66, %cst_33 {dimension_numbers = #tpu.dot_dimension_numbers<[1], [1], [0], [0], [0, 0, 1, 0], [], []>} : vector<8x8xf32>, vector<8x8xf32>, vector<8x8xf32> -> vector<8x8xf32>
    %cst_34 = arith.constant dense<0xFF800000> : vector<8xf32>
    %69 = vector.multi_reduction <maximumf>, %68, %cst_34 [1] : vector<8x8xf32> to vector<8xf32>
    %70 = vector.shape_cast %69 : vector<8xf32> to vector<8x1xf32>
    %71 = vector.broadcast %70 : vector<8x1xf32> to vector<8x8xf32>
    %72 = arith.subf %68, %71 : vector<8x8xf32>
    %73 = math.exp %72 : vector<8x8xf32>
    %cst_35 = arith.constant dense<0.000000e+00> : vector<8xf32>
    %74 = vector.multi_reduction <add>, %73, %cst_35 [1] : vector<8x8xf32> to vector<8xf32>
    %75 = vector.shape_cast %74 : vector<8xf32> to vector<8x1xf32>
    %cst_36 = arith.constant dense<0.000000e+00> : vector<8x8xf32>
    %76 = tpu.matmul %73, %67, %cst_36 {dimension_numbers = #tpu.dot_dimension_numbers<[1], [0], [0], [1], [0, 0, 1, 1], [], []>} : vector<8x8xf32>, vector<8x8xf32>, vector<8x8xf32> -> vector<8x8xf32>
    %77 = tpu.reciprocal %75 : vector<8x1xf32> -> vector<8x1xf32>
    %78 = vector.broadcast %77 : vector<8x1xf32> to vector<8x8xf32>
    %79 = arith.mulf %76, %78 : vector<8x8xf32>
    %80 = arith.index_cast %c0_i32 : i32 to index
    %c0_37 = arith.constant 0 : index
    %c16 = arith.constant 16 : index
    %81 = vector.load %arg10[%80, %c0_37, %c16] : memref<1x8x32xf32, #tpu.memory_space<vmem>>, vector<1x8x8xf32>
    %82 = vector.shape_cast %81 : vector<1x8x8xf32> to vector<8x8xf32>
    %83 = vector.shape_cast %79 : vector<8x8xf32> to vector<1x8x8xf32>
    tpu.vector_store %arg10[%80, %c0_37, %c16], %83 {strides = array<i32>} : memref<1x8x32xf32, #tpu.memory_space<vmem>>, vector<1x8x8xf32>,
    %84 = vector.extract_strided_slice %20 {offsets = [0, 24], sizes = [8, 8], strides = [1, 1]} : vector<8x32xf32> to vector<8x8xf32>
    %85 = vector.extract_strided_slice %23 {offsets = [0, 24], sizes = [8, 8], strides = [1, 1]} : vector<8x32xf32> to vector<8x8xf32>
    %86 = vector.extract_strided_slice %26 {offsets = [0, 24], sizes = [8, 8], strides = [1, 1]} : vector<8x32xf32> to vector<8x8xf32>
    %cst_38 = arith.constant dense<0.000000e+00> : vector<8x8xf32>
    %87 = tpu.matmul %84, %85, %cst_38 {dimension_numbers = #tpu.dot_dimension_numbers<[1], [1], [0], [0], [0, 0, 1, 0], [], []>} : vector<8x8xf32>, vector<8x8xf32>, vector<8x8xf32> -> vector<8x8xf32>
    %cst_39 = arith.constant dense<0xFF800000> : vector<8xf32>
    %88 = vector.multi_reduction <maximumf>, %87, %cst_39 [1] : vector<8x8xf32> to vector<8xf32>
    %89 = vector.shape_cast %88 : vector<8xf32> to vector<8x1xf32>
    %90 = vector.broadcast %89 : vector<8x1xf32> to vector<8x8xf32>
    %91 = arith.subf %87, %90 : vector<8x8xf32>
    %92 = math.exp %91 : vector<8x8xf32>
    %cst_40 = arith.constant dense<0.000000e+00> : vector<8xf32>
    %93 = vector.multi_reduction <add>, %92, %cst_40 [1] : vector<8x8xf32> to vector<8xf32>
    %94 = vector.shape_cast %93 : vector<8xf32> to vector<8x1xf32>
    %cst_41 = arith.constant dense<0.000000e+00> : vector<8x8xf32>
    %95 = tpu.matmul %92, %86, %cst_41 {dimension_numbers = #tpu.dot_dimension_numbers<[1], [0], [0], [1], [0, 0, 1, 1], [], []>} : vector<8x8xf32>, vector<8x8xf32>, vector<8x8xf32> -> vector<8x8xf32>
    %96 = tpu.reciprocal %94 : vector<8x1xf32> -> vector<8x1xf32>
    %97 = vector.broadcast %96 : vector<8x1xf32> to vector<8x8xf32>
    %98 = arith.mulf %95, %97 : vector<8x8xf32>
    %99 = arith.index_cast %c0_i32 : i32 to index
    %c0_42 = arith.constant 0 : index
    %c24 = arith.constant 24 : index
    %100 = vector.load %arg10[%99, %c0_42, %c24] : memref<1x8x32xf32, #tpu.memory_space<vmem>>, vector<1x8x8xf32>
    %101 = vector.shape_cast %100 : vector<1x8x8xf32> to vector<8x8xf32>
    %102 = vector.shape_cast %98 : vector<8x8xf32> to vector<1x8x8xf32>
    tpu.vector_store %arg10[%99, %c0_42, %c24], %102 {strides = array<i32>} : memref<1x8x32xf32, #tpu.memory_space<vmem>>, vector<1x8x8xf32>,
    %c1_i32 = arith.constant 1 : i32
    %c0_43 = arith.constant 0 : index
    %c0_44 = arith.constant 0 : index
    %c0_45 = arith.constant 0 : index
    %103 = vector.load %arg10[%c0_43, %c0_44, %c0_45] : memref<1x8x32xf32, #tpu.memory_space<vmem>>, vector<1x8x32xf32>
    %104 = vector.shape_cast %103 : vector<1x8x32xf32> to vector<8x32xf32>
    %c0_46 = arith.constant 0 : index
    %c0_47 = arith.constant 0 : index
    %105 = vector.load %arg4[%c0_46, %c0_47] : memref<32x32xf32, #tpu.memory_space<vmem>>, vector<32x32xf32>
    %cst_48 = arith.constant dense<0.000000e+00> : vector<8x32xf32>
    %106 = tpu.matmul %104, %105, %cst_48 {dimension_numbers = #tpu.dot_dimension_numbers<[1], [0], [0], [1], [0, 0, 1, 1], [], []>} : vector<8x32xf32>, vector<32x32xf32>, vector<8x32xf32> -> vector<8x32xf32>
    %c0_49 = arith.constant 0 : index
    %c0_50 = arith.constant 0 : index
    %107 = vector.load %arg5[%c0_49, %c0_50] : memref<1x32xf32, #tpu.memory_space<vmem>>, vector<1x32xf32>
    %108 = vector.broadcast %107 : vector<1x32xf32> to vector<8x32xf32>
    %109 = arith.addf %106, %108 : vector<8x32xf32>
    %110 = vector.shape_cast %109 : vector<8x32xf32> to vector<1x8x32xf32>
    %c0_51 = arith.constant 0 : index
    %c0_52 = arith.constant 0 : index
    %c0_53 = arith.constant 0 : index
    %111 = vector.load %arg6[%c0_51, %c0_52, %c0_53] : memref<1x8x32xf32, #tpu.memory_space<vmem>>, vector<1x8x32xf32>
    tpu.vector_store %arg6[%c0_51, %c0_52, %c0_53], %110 {strides = array<i32>} : memref<1x8x32xf32, #tpu.memory_space<vmem>>, vector<1x8x32xf32>,
    return
  }
  func.func @transform_0(%arg0: i32) -> (i32, i32, i32) {
    %c0_i32 = arith.constant 0 : i32
    %c0_i32_0 = arith.constant 0 : i32
    %c0_i32_1 = arith.constant 0 : i32
    return %arg0, %c0_i32, %c0_i32_0 : i32, i32, i32
  }
  func.func @transform_1(%arg0: i32) -> (i32, i32) {
    %c0_i32 = arith.constant 0 : i32
    %c0_i32_0 = arith.constant 0 : i32
    %c0_i32_1 = arith.constant 0 : i32
    return %c0_i32, %c0_i32_0 : i32, i32
  }
  func.func @transform_2(%arg0: i32) -> (i32, i32) {
    %c0_i32 = arith.constant 0 : i32
    %c0_i32_0 = arith.constant 0 : i32
    %c0_i32_1 = arith.constant 0 : i32
    return %c0_i32, %c0_i32_0 : i32, i32
  }
  func.func @transform_3(%arg0: i32) -> (i32, i32) {
    %c0_i32 = arith.constant 0 : i32
    %c0_i32_0 = arith.constant 0 : i32
    %c0_i32_1 = arith.constant 0 : i32
    return %c0_i32, %c0_i32_0 : i32, i32
  }
  func.func @transform_4(%arg0: i32) -> (i32, i32) {
    %c0_i32 = arith.constant 0 : i32
    %c0_i32_0 = arith.constant 0 : i32
    %c0_i32_1 = arith.constant 0 : i32
    return %c0_i32, %c0_i32_0 : i32, i32
  }
  func.func @transform_5(%arg0: i32) -> (i32, i32, i32) {
    %c0_i32 = arith.constant 0 : i32
    %c0_i32_0 = arith.constant 0 : i32
    %c0_i32_1 = arith.constant 0 : i32
    return %arg0, %c0_i32, %c0_i32_0 : i32, i32, i32
  }
  func.func @transform_6(%arg0: i32) -> (i32, i32, i32) {
    %c0_i32 = arith.constant 0 : i32
    %c0_i32_0 = arith.constant 0 : i32
    %c0_i32_1 = arith.constant 0 : i32
    return %arg0, %c0_i32, %c0_i32_0 : i32, i32, i32
  }
  func.func @transform_7(%arg0: i32) -> (i32, i32, i32) {
    %c0_i32 = arith.constant 0 : i32
    %c0_i32_0 = arith.constant 0 : i32
    %c0_i32_1 = arith.constant 0 : i32
    return %arg0, %c0_i32, %c0_i32_0 : i32, i32, i32
  }
  func.func @transform_8(%arg0: i32) -> (i32, i32, i32) {
    %c0_i32 = arith.constant 0 : i32
    %c0_i32_0 = arith.constant 0 : i32
    %c0_i32_1 = arith.constant 0 : i32
    return %arg0, %c0_i32, %c0_i32_0 : i32, i32, i32
  }
}

</mosaic_0001>

<bundles_post_ra>
// kernel: tpu_custom_call.1
= control target key start
LH: loop header
LB: loop body
LE: loop exit
PB: predicated region body
PF: predicated region fallthrough
CT: control target
= control target key end

     0   :  { %s2464_s0 = inlined_call_operand.hbm [shape: f32[2,8,32], index: 0, kind: input, shape index: {}]   ;;  %s2465_s1 = inlined_call_operand.hbm [shape: f32[32,96], index: 1, kind: input, shape index: {}]   ;;  %s2466_s2 = inlined_call_operand.vmem [shape: f32[1,96], index: 2, kind: input, shape index: {}]   ;;  %s2467_s3 = inlined_call_operand.hbm [shape: f32[32,32], index: 3, kind: input, shape index: {}]   ;;  %s2468_s4 = inlined_call_operand.vmem [shape: f32[1,32], index: 4, kind: input, shape index: {}]   ;;  %s2469_s5 = inlined_call_operand.hbm [shape: f32[2,8,32], index: 5, kind: output, shape index: {0}]   ;;  %s2470_s6 = inlined_call_operand.hbm [shape: f32[2,8,32], index: 6, kind: output, shape index: {1}]   ;;  %s2471_s7 = inlined_call_operand.hbm [shape: f32[2,8,32], index: 7, kind: output, shape index: {2}]   ;;  %s2472_s8 = inlined_call_operand.hbm [shape: f32[2,8,32], index: 8, kind: output, shape index: {3}]  }
   0x1   :  { %2477 = sst [smem:[#allocation20_spill]] %s2464_s0 }
   0x2   :  { %2478 = sst [smem:[#allocation21_spill]] %s2465_s1 }
   0x3   :  { %2479 = sst [smem:[#allocation22_spill]] %s2466_s2 }
   0x4   :  { %2480 = sst [smem:[#allocation23_spill]] %s2467_s3 }
   0x5   :  { %14 = vsyncpa [#allocation4], 0 }
   0x6   :  { %16 = vsyncpa [#allocation4 + $0x1], 0 }
   0x7   :  { %17 = vsyncpa [#allocation7], 0 }
   0x8   :  { %18 = vsyncpa [#allocation5], 0 }
   0x9   :  { %20 = vsyncpa [#allocation5 + $0x1], 0 }
   0xa   :  { %21 = vsyncpa [#allocation11], 0 }
   0xb   :  { %23 = vsyncpa [#allocation11 + $0x1], 0 }
   0xc   :  { %24 = vsyncpa [#allocation14], 0 }
   0xd   :  { %26 = vsyncpa [#allocation14 + $0x1], 0  ;;  %s2057_s27 = smov 0   ;;  %s2059_s28 = smov 0  }
   0xe   :  { %s2061_s29 = smov 0   ;;  %s2063_s30 = smov 0  }
   0xf LB: > { %s2078_s9 = sadd.s32 4294967295, %s1990_s30   ;;  %s2474_s10 = sadd.s32 4294967294, %s1990_s30   ;;  %s1990_s30 = sphi %s2063_s30, %s2502_s30   ;;  %s1986_s29 = sphi %s2061_s29, %s2501_s29   ;;  %s1982_s28 = sphi %s2059_s28, %s2500_s28   ;;  %s1978_s27 = sphi %s2057_s27, %s2499_s27  }
  0x10   : > { %p52_p0 = scmp.ne.s32.totalorder %s1982_s28, %s1978_s27  ;;  %p2473_p1 = scmp.eq.s32.totalorder %s2078_s9, 0 }
  0x11   : > { %p166_p3 = scmp.eq.s32.totalorder %s2474_s10, 1  ;;  %p1491_p5 = scmp.ge.s32.totalorder %s1990_s30, 1 }
  0x12   : > { %p2089_p4 = por %p2473_p1, %p52_p0  ;;  %p251_p7 = scmp.lt.s32.totalorder %s1990_s30, 3 }
  0x13   : > { %p2094_p6 = por %p166_p3, %p52_p0  ;;  %s1992_s14 = smov [#allocation6]  }
  0x14   : > { %s2481_s11 = scalar_select %p2089_p4, 1, 0 }
  0x15   : > { %s2482_s12 = scalar_select %p2094_p6, 1, 0 }
  0x16   : > { %p2099_p8 = pnand %p1491_p5, %p251_p7  ;;  %s263_s15 = sshll.u32 %s1992_s14, 4  ;;  %s2103_s15 = int_to_ptr.vmem [resolvable:$true] %s263_s15 }
  0x17   : > { %s1993_s17 = smov [#allocation8]   ;;  %s2485_s1 = sld [smem:[#allocation21_spill]] }
  0x18   : > { %p1649_p9 = pneg %p2099_p8  ;;  %s279_s18 = sshll.u32 %s1993_s17, 4  ;;  %s2114_s18 = int_to_ptr.vmem [resolvable:$true] %s279_s18 }
  0x1a   : > { %p2110_p11 = pnand %p1649_p9, %p2473_p1 }
  0x1c   : > { %p1744_p13 = pneg %p2110_p11 }
  0x1d   : > { %s1742_s21 = scalar_lea.hbm %s2485_s1, 512 }
  0x1e   : > { %p1743_p12 = scmp.ne.s32.totalorder %s2485_s1, %s1742_s21  ;;  %p1749_p5 = scmp.lt.u32.totalorder %s1742_s21, %s2485_s1 }
  0x20   : > { %p1745_p0 = pnand %p1744_p13, %p1743_p12 }
  0x22   : > { %p1746_p3 = pneg %p1745_p0 }
  0x24   : > { %p1751_p7 = pnand %p1749_p5, %p1746_p3 }
  0x26   : > { %1754 = shalt.err (!%p1751_p7)
}
  0x27   : > { %s1755_s26 = scalar_lea.vmem %s2103_s15, 512  ;;  %p1763_p2 = scmp.lt.s32.totalorder %s2103_s15, %s2103_s15 }
  0x28   : > { %p1756_p9 = scmp.ne.s32.totalorder %s2103_s15, %s1755_s26  ;;  %p1764_p12 = scmp.lt.s32.totalorder %s1755_s26, %s1755_s26 }
  0x2a   : > { %p1758_p10 = pnand %p1756_p9, %p1744_p13  ;;  %p1765_p0 = por %p1764_p12, %p1763_p2 }
  0x2c   : > { %p1759_p1 = pneg %p1758_p10 }
  0x2e   : > { %p1766_p6 = pnand %p1765_p0, %p1759_p1 }
  0x30   : > { %1769 = shalt.err (!%p1766_p6)
}
  0x31   : > { %s1994_s14 = smov 128   ;;  %s1995_s17 = smov 8  }
  0x32   : > { %1652 = dma.hbm_to_vmem [thread:$0]  (!%p2110_p11), %s2485_s1, 512, %s2103_s15, [#allocation7], %s1994_s14, %s1994_s14, %s1995_s17  }
  0x33   : > { %s2486_s3 = sld [smem:[#allocation23_spill]] }
  0x39   : > { %s1770_s23 = scalar_lea.hbm %s2486_s3, 512 }
  0x3a   : > { %p1771_p2 = scmp.ne.s32.totalorder %s2486_s3, %s1770_s23  ;;  %p1777_p10 = scmp.lt.u32.totalorder %s1770_s23, %s2486_s3 }
  0x3c   : > { %p1773_p1 = pnand %p1771_p2, %p1744_p13 }
  0x3e   : > { %p1774_p6 = pneg %p1773_p1 }
  0x40   : > { %p1779_p3 = pnand %p1777_p10, %p1774_p6 }
  0x42   : > { %1782 = shalt.err (!%p1779_p3)
}
  0x43   : > { %s1783_s15 = scalar_lea.vmem %s2114_s18, 512  ;;  %p1791_p12 = scmp.lt.s32.totalorder %s2114_s18, %s2114_s18 }
  0x44   : > { %p1784_p5 = scmp.ne.s32.totalorder %s2114_s18, %s1783_s15  ;;  %p1792_p0 = scmp.lt.s32.totalorder %s1783_s15, %s1783_s15 }
  0x46   : > { %p1786_p7 = pnand %p1784_p5, %p1744_p13  ;;  %p1793_p2 = por %p1792_p0, %p1791_p12 }
  0x48   : > { %p1787_p9 = pneg %p1786_p7 }
  0x4a   : > { %p1794_p1 = pnand %p1793_p2, %p1787_p9 }
  0x4c   : > { %1797 = shalt.err (!%p1794_p1)
}
  0x4d   : > { %1655 = dma.hbm_to_vmem [thread:$0]  (!%p2110_p11), %s2486_s3, 512, %s2114_s18, [#allocation7], %s1994_s14, %s1994_s14, %s1995_s17  }
  0x4e   : > { %s2169_s20 = sadd.s32 1, %s1990_s30   ;;  %s39_s16 = sadd.s32 1, %s1986_s29 }
  0x4f   : > { %s36_s21 = ssub.s32 %s1990_s30, %s2169_s20  ;;  %p46_p13 = scmp.ne.s32.totalorder %s1986_s29, %s1982_s28 }
  0x50   : > { %p37_p6 = scmp.eq.s32.totalorder %s36_s21, 0  ;;  %p47_p10 = scmp.eq.s32.totalorder %s1990_s30, 0 }
  0x51   : > { %p2487_p3 = scmp.eq.s32.totalorder %s2078_s9, 1  ;;  %p1675_p7 = scmp.lt.s32.totalorder %s1990_s30, 2 }
  0x52   : > { %s2185_s23 = scalar_select %p37_p6, %s1986_s29, %s39_s16  }
  0x53   : > { %p2179_p5 = por %p2487_p3, %p46_p13  ;;  %p48_p9 = por %p47_p10, %p46_p13 }
  0x54   : > { %s296_s24 = sand.u32 1, %s1986_s29   ;;  %s1496_s18 = sshll.u32 %s1990_s30, 7 }
  0x55   : > { %s2488_s22 = scalar_select %p2179_p5, 1, 0 }
  0x56   : > { %s1495_s25 = sshll.u32 %s296_s24, 3  ;;  %s2489_s0 = sld [smem:[#allocation20_spill]] }
  0x57   : > { %s300_s15 = scalar_lea.vmem [#allocation3], %s1495_s25  ;;  %p2196_p11 = pnand %p1675_p7, %p48_p9 }
  0x58   : > { %s307_s10 = sshll.u32 %s300_s15, 4  ;;  %s297_s16 = scalar_lea.sflag [#allocation4], %s296_s24  ;;  %s2194_s10 = int_to_ptr.vmem [resolvable:$true] %s307_s10 }
  0x59   : > { %p1800_p0 = pneg %p2196_p11 }
  0x5c   : > { %s2192_s26 = scalar_lea.hbm %s2489_s0, %s1496_s18  ;;  %s1803_s14 = scalar_lea.hbm %s2489_s0, 256 }
  0x5d   : > { %s1798_s21 = scalar_lea.hbm %s2192_s26, 128  ;;  %p1804_p13 = scmp.lt.u32.totalorder %s2192_s26, %s2489_s0 }
  0x5e   : > { %p1799_p12 = scmp.ne.s32.totalorder %s2192_s26, %s1798_s21  ;;  %p1805_p6 = scmp.lt.u32.totalorder %s1803_s14, %s1798_s21 }
  0x5f   : > { %p1807_p3 = scmp.lt.u32.totalorder %s1798_s21, %s2192_s26 }
  0x60   : > { %p1801_p2 = pnand %p1800_p0, %p1799_p12  ;;  %p1806_p10 = por %p1805_p6, %p1804_p13 }
  0x62   : > { %p1802_p1 = pneg %p1801_p2  ;;  %p1808_p7 = por %p1807_p3, %p1806_p10 }
  0x64   : > { %p1809_p9 = pnand %p1808_p7, %p1802_p1 }
  0x66   : > { %1812 = shalt.err (!%p1809_p9)
}
  0x67   : > { %s1813_s24 = scalar_lea.vmem %s2194_s10, 128  ;;  %s1996_s18 = smov [#allocation3]  }
  0x68   : > { %p1814_p12 = scmp.ne.s32.totalorder %s2194_s10, %s1813_s24  ;;  %s1818_s25 = sshll.u32 %s1996_s18, 4  ;;  %s1819_s25 = int_to_ptr.vmem [resolvable:$false] %s1818_s25 }
  0x69   : > { %s1820_s17 = scalar_lea.vmem %s1819_s25, 256  ;;  %p1821_p4 = scmp.lt.s32.totalorder %s2194_s10, %s1819_s25 }
  0x6a   : > { %p1816_p2 = pnand %p1814_p12, %p1800_p0  ;;  %p1822_p13 = scmp.lt.s32.totalorder %s1820_s17, %s1813_s24 }
  0x6c   : > { %p1817_p5 = pneg %p1816_p2  ;;  %p1823_p6 = por %p1822_p13, %p1821_p4 }
  0x6e   : > { %p1824_p10 = pnand %p1823_p6, %p1817_p5 }
  0x70   : > { %1827 = shalt.err (!%p1824_p10)
}
  0x71   : > { %1659 = dma.hbm_to_vmem [thread:$0]  (!%p2196_p11), %s2192_s26, 128, %s2194_s10, %s297_s16  }
  0x72   : > { %316 = sbr.rel (%p2099_p8) target bundleno = 1792 (0x700), region = 40  ;;  %s2228_s21 = sand.u32 (!%p2099_p8), 1, %s1982_s28  }
  0x73   : > { %s2231_s14 = sshll.u32 (!%p2099_p8), %s2228_s21, 3  ;;  %s319_s15 = scalar_lea.sflag (!%p2099_p8), [#allocation4], %s2228_s21 }
  0x74   : > { %s322_s24 = scalar_lea.vmem (!%p2099_p8), [#allocation3], %s2231_s14  ;;  %p2491_p4 = scmp.ne.s32.totalorder (!%p2099_p8), %s2481_s11, 0 }
  0x79   : > { %1957 = dma.done.wait (%p2491_p4), %s319_s15, 128  }
  0x7a   : > { %1959 = vsyncadd (%p2491_p4), %s319_s15, 4294967168  ;;  %p2492_p5 = scmp.eq.s32.totalorder %s2078_s9, 0 }
  0x7c   : > { %1961 = dma.done.wait (%p2492_p5), [#allocation7], 1024   ;;  %p2493_p8 = pmov %p2492_p5 }
  0x7d   : > { %v1997_v0 = vmov 0.0|0.0   ;;  %vm1998_vm0 = vmmov 0   ;;  %v1999_v1 = vmov 0.0   ;;  %v379_v2 = vld [vmem:[#allocation6] sm:$0xff]  ;;  %v380_v3 = vld [vmem:[#allocation6 + $0x8] sm:$0xff]  ;;  %v381_v4 = vld [vmem:[#allocation6 + $0x10] sm:$0xff] }
  0x7e   : > { %1963 = vsyncadd (%p2493_p8), [#allocation7], 4294966272  ;;  %1619 = vmatprep.subr.bf16.mxu0 %v1997_v0  ;;  %1565 = vmatprep.mubr.msk.f32.mxu0 %vm1998_vm0, %v1999_v1  ;;  %v1620_v5 = vpack.c.bf16 %v380_v3, %v379_v2  ;;  %v382_v6 = vld [vmem:[#allocation6 + $0x18] sm:$0xff]  ;;  %vm390_vm1 = vcmask 261120   ;;  %s2494_s2 = sld [smem:[#allocation22_spill]]  ;;  %s2258_s26 = scalar_lea.vmem [#allocation10], %s2231_s14 }
  0x7f   : > { %1568 = vmatprep.subr.mxu1 %v1999_v1  ;;  %1570 = vmatprep.mubr.msk.f32.mxu1 %vm1998_vm0, %v1999_v1  ;;  %v1623_v7 = vpack.c.bf16 %v382_v6, %v381_v4  ;;  %v378_v8 = vld [vmem:[%s322_s24] sm:$0xff]  ;;  %s2000_s10 = smov 64   ;;  %s2001_s19 = smov 96   ;;  %vm478_vm2 = vcmask 64512   ;;  %v1155_v6 = vld [vmem:[#allocation8] sm:$0xff]  ;;  %vm810_vm3 = vcmask 130112  }
  0x80   : > { %1621 = vmatpush3.bf16.msra.mxu0 %v1620_v5  ;;  %s2263_s16 = scalar_lea.vmem [#allocation13], %s2231_s14  ;;  %s2268_s18 = scalar_lea.vmem [#allocation12], %s2231_s14  ;;  %vm981_vm4 = vcmask 195712   ;;  %vm1152_vm5 = vcmask 261312  }
  0x81   : > { %1622 = vmatprep.subr.bf16.mxu0 %v1997_v0  ;;  %s2002_s25 = smov 120   ;;  %s2003_s17 = smov 112  }
  0x82   : > { %s2004_s15 = smov 104   ;;  %s2005_s24 = smov 8  }
  0x83   : > { %s2006_s11 = smov 16   ;;  %s2007_s13 = smov 24  }
  0x84   : > { %1624 = vmatpush3.bf16.msra.mxu0 %v1623_v7  ;;  %v1505_v9 = vld [vmem:[%s2494_s2] ss:$0 sm:$0xff]  ;;  %p2495_p0 = scmp.ne.s32.totalorder %s2488_s22, 0  ;;  %s2008_s0 = smov [#allocation10]  }
  0x85   : > { %1588 = vmatprep.subr.mxu0 %v1999_v1  ;;  %v1156_v7 = vld [vmem:[#allocation8 + $0x8] sm:$0xff]  ;;  %s1832_s1 = sshll.u32 %s2008_s0, 4  ;;  %s1833_s1 = int_to_ptr.vmem [resolvable:$false] %s1832_s1 }
  0x87   : > { %1566 = vmatmul.mubr.msk.f32.vlgmr.msra.gmra.mrb[0].mxu0 %vm390_vm1, %v378_v8  ;;  %v1157_v8 = vld [vmem:[#allocation8 + $0x10] sm:$0xff] }
  0x88   : > { %1590 = vmatprep.mubr.msk.f32.mxu0 %vm1998_vm0, %v1999_v1 }
 0x15a   : > { %v460_v10 = vpop.f32.mrb[0].mxu0 }
 0x15b   : > { %v461_v11 = vadd.f32 %v1505_v9, %v460_v10  ;;  %v1567_v12 = vpop.f32.mrb[1].mxu0  ;;  %v1158_v9 = vld [vmem:[#allocation8 + $0x18] sm:$0xff] }
 0x15c   : > { %v1629_v12 = vpack.c.bf16 %v1158_v9, %v1157_v8 }
 0x15d   : > { %464 = vst.msk [vmem:[%s2258_s26] sm:$0xff] %vm390_vm1, %v461_v11  ;;  %470 = vrot.lane.b32.xlu1 %v461_v11, %s2000_s10  ;;  %466 = vrot.lane.b32.xlu0 %v461_v11, %s2001_s19  ;;  %s1245_s10 = sand.u32 1, %s2078_s9   ;;  %s2330_s19 = sshll.u32 %s2078_s9, 7 }
 0x15e   : > { %s1834_s9 = scalar_lea.vmem %s1833_s1, 256 }
 0x164   : > { %v474_v15 = vld [vmem:[%s2258_s26] sm:$0xff] }
 0x165   : > { %v475_v17 = vmul.f32 0.35355338, %v474_v15 }
 0x1cf   : > { %v471_v13 = vpop.permute.xlu1 %470  ;;  %v467_v14 = vpop.permute.xlu0 %466 }
 0x1d0   : > { %473 = vst.msk [vmem:[%s2263_s16] sm:$0xff] %vm390_vm1, %v471_v13  ;;  %469 = vst.msk [vmem:[%s2268_s18] sm:$0xff] %vm390_vm1, %v467_v14 }
 0x1d7   : > { %v476_v16 = vld [vmem:[%s2268_s18] sm:$0xff]  ;;  %v477_v18 = vld [vmem:[%s2263_s16] sm:$0xff] }
 0x1d8   : > { %642 = vrot.lane.b32.xlu1 %v476_v16, %s2002_s25  ;;  %1569 = vmatpush3.xpose.msk.msra.mxu1 %vm478_vm2, %v476_v16 }
 0x1d9   : > { %1573 = vmatprep.subr.mxu1 %v1999_v1 }
 0x1db   : > { %1571 = vmatmul.mubr.msk.f32.vlgmr.msra.gmra.mrb[0].mxu1 %vm478_vm2, %v475_v17 }
 0x1dc   : > { %640 = vrot.lane.b32.xlu1 %v475_v17, %s2002_s25  ;;  %1574 = vmatpush3.msra.mxu1 %v477_v18 }
 0x1dd   : > { %1575 = vmatprep.mubr.msk.f32.mxu1 %vm1998_vm0, %v1999_v1  ;;  %1578 = vmatprep.subr.mxu1 %v1999_v1 }
 0x1e0   : > { %814 = vrot.lane.b32.xlu1 %v476_v16, %s2003_s17 }
 0x1e4   : > { %812 = vrot.lane.b32.xlu1 %v475_v17, %s2003_s17 }
 0x1e8   : > { %985 = vrot.lane.b32.xlu1 %v476_v16, %s2004_s15 }
 0x1ec   : > { %983 = vrot.lane.b32.xlu1 %v475_v17, %s2004_s15 }
 0x24a   : > { %v643_v19 = vpop.permute.xlu1 %642 }
 0x24e   : > { %v641_v20 = vpop.permute.xlu1 %640 }
 0x252   : > { %v815_v21 = vpop.permute.xlu1 %814 }
 0x253   : > { %1589 = vmatpush3.xpose.msk.msra.mxu0 %vm478_vm2, %v815_v21 }
 0x254   : > { %1598 = vmatprep.subr.mxu0 %v1999_v1 }
 0x256   : > { %v813_v22 = vpop.permute.xlu1 %812 }
 0x257   : > { %1591 = vmatmul.mubr.msk.f32.vlgmr.msra.gmra.mrb[2].mxu0 %vm478_vm2, %v813_v22 }
 0x258   : > { %1600 = vmatprep.mubr.msk.f32.mxu0 %vm1998_vm0, %v1999_v1 }
 0x25a   : > { %v986_v23 = vpop.permute.xlu1 %985 }
 0x25b   : > { %1599 = vmatpush3.xpose.msk.msra.mxu0 %vm478_vm2, %v986_v23 }
 0x25c   : > { %1625 = vmatprep.subr.bf16.mxu0 %v1997_v0 }
 0x25e   : > { %v984_v24 = vpop.permute.xlu1 %983 }
 0x25f   : > { %1601 = vmatmul.mubr.msk.f32.vlgmr.msra.gmra.mrb[4].mxu0 %vm478_vm2, %v984_v24 }
 0x260   : > { %1616 = vmatprep.mubr.msk.f32.mxu0 %vm1998_vm0, %v1999_v1 }
 0x2ae   : > { %v551_v25 = vpop.f32.mrb[0].mxu1 }
 0x2af   : > { %v1572_v26 = vpop.f32.mrb[1].mxu1  ;;  %v555_v27 = vsel %vm478_vm2, %v551_v25, -inf }
 0x2b0   : > { %556 = vmax.xlane.f32.xlu0 %v555_v27 }
 0x2c6   : > { %728 = vrot.lane.b32.xlu0 %v477_v18, %s2002_s25 }
 0x32a   : > { %v886_v28 = vpop.f32.mrb[2].mxu0 }
 0x32b   : > { %v1592_v29 = vpop.f32.mrb[3].mxu0  ;;  %v890_v30 = vsel %vm478_vm2, %v886_v28, -inf }
 0x32c   : > { %891 = vmax.xlane.f32.xlu0 %v890_v30 }
 0x332   : > { %v1057_v31 = vpop.f32.mrb[4].mxu0 }
 0x333   : > { %v1602_v32 = vpop.f32.mrb[5].mxu0  ;;  %v1061_v33 = vsel %vm478_vm2, %v1057_v31, -inf }
 0x334   : > { %1062 = vmax.xlane.f32.xlu0 %v1061_v33 }
 0x33d   : > { %v557_v34 = vpop.xlane.xlu0 %556 }
 0x33e   : > { %v558_v35 = vsub.f32 %v551_v25, %v557_v34 }
 0x340   : > { %v559_v36 = vmul.f32 1.442695, %v558_v35 }
 0x341   : > { %v729_v38 = vpop.permute.xlu0 %728 }
 0x342   : > { %1726 = vpow2.f32 %v559_v36 }
 0x34a   : > { %1070 = vrot.lane.b32.xlu0 %v477_v18, %s2004_s15  ;;  %s2336_s15 = scalar_lea.hbm %s2470_s6, %s2330_s19 }
 0x34c   : > { %v1727_v37 = vpop.eup %1726 }
 0x34d   : > { %1576 = vmatmul.mubr.msk.f32.vlgmr.msra.gmra.mrb[2].mxu1 %vm478_vm2, %v1727_v37  ;;  %v561_v61 = vsel %vm478_vm2, %v1727_v37, 0.0 }
 0x34e   : > { %1579 = vmatpush3.xpose.msk.msra.mxu1 %vm478_vm2, %v643_v19  ;;  %1580 = vmatprep.mubr.msk.f32.mxu1 %vm1998_vm0, %v1999_v1 }
 0x34f   : > { %1583 = vmatprep.subr.mxu1 %v1999_v1 }
 0x351   : > { %1581 = vmatmul.mubr.msk.f32.vlgmr.msra.gmra.mrb[4].mxu1 %vm478_vm2, %v641_v20 }
 0x352   : > { %1584 = vmatpush3.msra.mxu1 %v729_v38  ;;  %1585 = vmatprep.mubr.msk.f32.mxu1 %vm1998_vm0, %v1999_v1 }
 0x353   : > { %1593 = vmatprep.subr.mxu1 %v1999_v1 }
 0x3b9   : > { %v892_v44 = vpop.xlane.xlu0 %891 }
 0x3ba   : > { %v893_v45 = vsub.f32 %v886_v28, %v892_v44 }
 0x3bc   : > { %v894_v46 = vmul.f32 1.442695, %v893_v45 }
 0x3be   : > { %1728 = vpow2.f32 %v894_v46 }
 0x3c1   : > { %v1063_v49 = vpop.xlane.xlu0 %1062 }
 0x3c2   : > { %v1064_v50 = vsub.f32 %v1057_v31, %v1063_v49 }
 0x3c4   : > { %v1065_v53 = vmul.f32 1.442695, %v1064_v50 }
 0x3c5   : > { %v1071_v59 = vpop.permute.xlu0 %1070 }
 0x3c8   : > { %v1729_v47 = vpop.eup %1728 }
 0x3c9   : > { %v896_v48 = vsel %vm478_vm2, %v1729_v47, 0.0 }
 0x420   : > { %v633_v39 = vpop.f32.mrb[2].mxu1 }
 0x421   : > { %v1577_v40 = vpop.f32.mrb[3].mxu1 }
 0x424   : > { %v714_v41 = vpop.f32.mrb[4].mxu1 }
 0x425   : > { %v1582_v42 = vpop.f32.mrb[5].mxu1  ;;  %v718_v43 = vsel %vm478_vm2, %v714_v41, -inf }
 0x426   : > { %719 = vmax.xlane.f32.xlu1 %v718_v43 }
 0x437   : > { %899 = vrot.lane.b32.xlu1 %v477_v18, %s2003_s17 }
 0x45b   : > { %897 = vadd.xlane.f32.xlu1 %v896_v48 }
 0x4b3   : > { %v720_v51 = vpop.xlane.xlu1 %719 }
 0x4b4   : > { %v721_v52 = vsub.f32 %v714_v41, %v720_v51 }
 0x4b6   : > { %v722_v54 = vmul.f32 1.442695, %v721_v52 }
 0x4b7   : > { %v900_v56 = vpop.permute.xlu1 %899 }
 0x4b8   : > { %1730 = vpow2.f32 %v722_v54 }
 0x4b9   : > { %1732 = vpow2.f32 %v1065_v53 }
 0x4c2   : > { %v1731_v55 = vpop.eup %1730 }
 0x4c3   : > { %1586 = vmatmul.mubr.msk.f32.vlgmr.msra.gmra.mrb[6].mxu1 %vm478_vm2, %v1731_v55  ;;  %v724_v57 = vsel %vm478_vm2, %v1731_v55, 0.0  ;;  %v1733_v58 = vpop.eup %1732 }
 0x4c4   : > { %1594 = vmatpush3.msra.mxu1 %v900_v56  ;;  %725 = vadd.xlane.f32.xlu0 %v724_v57  ;;  %v1067_v60 = vsel %vm478_vm2, %v1733_v58, 0.0 }
 0x4c5   : > { %1595 = vmatprep.mubr.msk.f32.mxu1 %vm1998_vm0, %v1999_v1  ;;  %1603 = vmatprep.subr.mxu1 %v1999_v1 }
 0x4c7   : > { %1596 = vmatmul.mubr.msk.f32.vlgmr.msra.gmra.mrb[8].mxu1 %vm478_vm2, %v1729_v47 }
 0x4c8   : > { %1604 = vmatpush3.msra.mxu1 %v1071_v59  ;;  %1068 = vadd.xlane.f32.xlu0 %v1067_v60 }
 0x4c9   : > { %1605 = vmatprep.mubr.msk.f32.mxu1 %vm1998_vm0, %v1999_v1  ;;  %v1626_v1 = vpack.c.bf16 %v1156_v7, %v1155_v6 }
 0x4cb   : > { %1606 = vmatmul.mubr.msk.f32.vlgmr.msra.gmra.mrb[10].mxu1 %vm478_vm2, %v1733_v58  ;;  %1627 = vmatpush3.bf16.msra.mxu0 %v1626_v1 }
 0x4cc   : > { %562 = vadd.xlane.f32.xlu0 %v561_v61  ;;  %1628 = vmatprep.subr.bf16.mxu0 %v1997_v0 }
 0x4cf   : > { %1630 = vmatpush3.bf16.msra.mxu0 %v1629_v12 }
 0x4e8   : > { %v898_v5 = vpop.xlane.xlu1 %897 }
 0x551   : > { %v726_v62 = vpop.xlane.xlu0 %725 }
 0x555   : > { %v1069_v63 = vpop.xlane.xlu0 %1068 }
 0x559   : > { %v563_v2 = vpop.xlane.xlu0 %562 }
 0x55a   : > { %1734 = vrcp.f32 %v563_v2 }
 0x55b   : > { %1736 = vrcp.f32 %v726_v62 }
 0x55c   : > { %1738 = vrcp.f32 %v898_v5 }
 0x55d   : > { %1740 = vrcp.f32 %v1069_v63 }
 0x564   : > { %v1735_v3 = vpop.eup %1734 }
 0x565   : > { %v638_v4 = vmul.f32 %v1735_v3, %v633_v39  ;;  %v1737_v10 = vpop.eup %1736 }
 0x566   : > { %v1739_v15 = vpop.eup %1738 }
 0x567   : > { %639 = vst.msk [vmem:[#allocation2] sm:$0xff] %vm478_vm2, %v638_v4  ;;  %v1741_v19 = vpop.eup %1740 }
 0x596   : > { %v800_v11 = vpop.f32.mrb[6].mxu1 }
 0x597   : > { %v805_v13 = vmul.f32 %v1737_v10, %v800_v11  ;;  %v1587_v14 = vpop.f32.mrb[7].mxu1 }
 0x599   : > { %807 = vrot.lane.b32.xlu0 %v805_v13, %s2005_s24  ;;  %s1282_s24 = sshll.u32 %s2258_s26, 4  ;;  %s1283_s24 = int_to_ptr.vmem [resolvable:$true] %s1282_s24 }
 0x59a   : > { %v971_v16 = vpop.f32.mrb[8].mxu1  ;;  %p1835_p7 = scmp.lt.s32.totalorder %s1283_s24, %s1833_s1 }
 0x59b   : > { %v976_v17 = vmul.f32 %v1739_v15, %v971_v16  ;;  %v1597_v18 = vpop.f32.mrb[9].mxu1 }
 0x59d   : > { %978 = vrot.lane.b32.xlu1 %v976_v17, %s2006_s11  ;;  %s2339_s11 = scalar_lea.sflag [#allocation11], %s1245_s10 }
 0x59e   : > { %v1142_v20 = vpop.f32.mrb[10].mxu1 }
 0x59f   : > { %v1147_v21 = vmul.f32 %v1741_v19, %v1142_v20  ;;  %v1607_v22 = vpop.f32.mrb[11].mxu1 }
 0x5a1   : > { %1149 = vrot.lane.b32.xlu0 %v1147_v21, %s2007_s13  ;;  %s1828_s13 = scalar_lea.vmem %s1283_s24, 128 }
 0x5a2   : > { %p1829_p11 = scmp.ne.s32.totalorder %s1283_s24, %s1828_s13  ;;  %p1836_p9 = scmp.lt.s32.totalorder %s1834_s9, %s1828_s13 }
 0x5a4   : > { %p1830_p1 = pnand %p1829_p11, %p2495_p0  ;;  %p1837_p12 = por %p1836_p9, %p1835_p7 }
 0x5a6   : > { %p1831_p3 = pneg %p1830_p1 }
 0x5a8   : > { %p1838_p2 = pnand %p1837_p12, %p1831_p3 }
 0x60b   : > { %v808_v0 = vpop.permute.xlu0 %807 }
 0x60c   : > { %811 = vst.msk [vmem:[#allocation2] sm:$0xff] %vm810_vm3, %v808_v0 }
 0x60f   : > { %v979_v23 = vpop.permute.xlu1 %978 }
 0x610   : > { %982 = vst.msk [vmem:[#allocation2] sm:$0xff] %vm981_vm4, %v979_v23 }
 0x613   : > { %v1150_v24 = vpop.permute.xlu0 %1149 }
 0x614   : > { %1153 = vst.msk [vmem:[#allocation2] sm:$0xff] %vm1152_vm5, %v1150_v24 }
 0x61b   : > { %v1154_v25 = vld [vmem:[#allocation2] sm:$0xff] }
 0x61c   : > { %1617 = vmatmul.mubr.msk.f32.vlgmr.msra.gmra.mrb[6].mxu0 %vm390_vm1, %v1154_v25 }
 0x61d   : > { %1841 = shalt.err (!%p1838_p2)
}
 0x61e   : > { %s1842_s26 = scalar_lea.hbm %s2336_s15, 128  ;;  %s1846_s0 = scalar_lea.hbm %s2470_s6, 256 }
 0x61f   : > { %p1843_p13 = scmp.ne.s32.totalorder %s2336_s15, %s1842_s26  ;;  %p1847_p4 = scmp.lt.u32.totalorder %s2336_s15, %s2470_s6 }
 0x620   : > { %p1848_p5 = scmp.lt.u32.totalorder %s1846_s0, %s1842_s26  ;;  %p1850_p11 = scmp.lt.u32.totalorder %s1842_s26, %s2336_s15 }
 0x621   : > { %p1844_p6 = pnand %p1843_p13, %p2495_p0 }
 0x622   : > { %p1849_p8 = por %p1848_p5, %p1847_p4 }
 0x623   : > { %p1845_p10 = pneg %p1844_p6 }
 0x624   : > { %p1851_p1 = por %p1850_p11, %p1849_p8 }
 0x626   : > { %p1852_p3 = pnand %p1851_p1, %p1845_p10 }
 0x628   : > { %1855 = shalt.err (!%p1852_p3)
}
 0x629   : > { %1642 = dma.vmem_to_hbm [thread:$0]  (%p2495_p0), %s1283_s24, 128, %s2336_s15, %s2339_s11  }
 0x62a   : > { %s2363_s10 = scalar_lea.hbm %s2471_s7, %s2330_s19  ;;  %s1295_s25 = sshll.u32 %s2268_s18, 4  ;;  %s1296_s25 = int_to_ptr.vmem [resolvable:$true] %s1295_s25 }
 0x62b   : > { %s2370_s17 = scalar_lea.hbm %s2472_s8, %s2330_s19  ;;  %s1856_s1 = scalar_lea.vmem %s1296_s25, 128 }
 0x62c   : > { %p1857_p7 = scmp.ne.s32.totalorder %s1296_s25, %s1856_s1  ;;  %s2009_s2 = smov [#allocation12]  }
 0x62d   : > { %s1860_s3 = sshll.u32 %s2009_s2, 4  ;;  %s1861_s3 = int_to_ptr.vmem [resolvable:$false] %s1860_s3 }
 0x62e   : > { %p1858_p9 = pnand %p1857_p7, %p2495_p0  ;;  %s1862_s15 = scalar_lea.vmem %s1861_s3, 256 }
 0x62f   : > { %p1863_p2 = scmp.lt.s32.totalorder %s1296_s25, %s1861_s3  ;;  %p1864_p13 = scmp.lt.s32.totalorder %s1862_s15, %s1856_s1 }
 0x630   : > { %p1859_p12 = pneg %p1858_p9 }
 0x631   : > { %p1865_p6 = por %p1864_p13, %p1863_p2 }
 0x633   : > { %p1866_p10 = pnand %p1865_p6, %p1859_p12 }
 0x635   : > { %1869 = shalt.err (!%p1866_p10)
}
 0x636   : > { %s1870_s18 = scalar_lea.hbm %s2363_s10, 128  ;;  %s1874_s2 = scalar_lea.hbm %s2471_s7, 256 }
 0x637   : > { %p1871_p4 = scmp.ne.s32.totalorder %s2363_s10, %s1870_s18  ;;  %p1875_p11 = scmp.lt.u32.totalorder %s2363_s10, %s2471_s7 }
 0x638   : > { %p1876_p1 = scmp.lt.u32.totalorder %s1874_s2, %s1870_s18  ;;  %p1878_p7 = scmp.lt.u32.totalorder %s1870_s18, %s2363_s10 }
 0x639   : > { %p1872_p5 = pnand %p1871_p4, %p2495_p0 }
 0x63a   : > { %p1877_p3 = por %p1876_p1, %p1875_p11 }
 0x63b   : > { %p1873_p8 = pneg %p1872_p5 }
 0x63c   : > { %p1879_p9 = por %p1878_p7, %p1877_p3 }
 0x63e   : > { %p1880_p12 = pnand %p1879_p9, %p1873_p8 }
 0x640   : > { %1883 = shalt.err (!%p1880_p12)
}
 0x641   : > { %1643 = dma.vmem_to_hbm [thread:$0]  (%p2495_p0), %s1296_s25, 128, %s2363_s10, %s2339_s11  }
 0x642   : > { %s1308_s26 = sshll.u32 %s2263_s16, 4  ;;  %s1256_s0 = scalar_lea.sflag [#allocation14], %s2228_s21  ;;  %s1309_s26 = int_to_ptr.vmem [resolvable:$true] %s1308_s26 }
 0x643   : > { %s1884_s1 = scalar_lea.vmem %s1309_s26, 128  ;;  %s2010_s15 = smov [#allocation13]  }
 0x644   : > { %p1885_p2 = scmp.ne.s32.totalorder %s1309_s26, %s1884_s1  ;;  %s1888_s18 = sshll.u32 %s2010_s15, 4  ;;  %s1889_s18 = int_to_ptr.vmem [resolvable:$false] %s1888_s18 }
 0x645   : > { %s1890_s24 = scalar_lea.vmem %s1889_s18, 256  ;;  %p1891_p10 = scmp.lt.s32.totalorder %s1309_s26, %s1889_s18 }
 0x646   : > { %p1886_p13 = pnand %p1885_p2, %p2495_p0  ;;  %p1892_p4 = scmp.lt.s32.totalorder %s1890_s24, %s1884_s1 }
 0x648   : > { %p1887_p6 = pneg %p1886_p13  ;;  %p1893_p5 = por %p1892_p4, %p1891_p10 }
 0x64a   : > { %p1894_p8 = pnand %p1893_p5, %p1887_p6 }
 0x64c   : > { %1897 = shalt.err (!%p1894_p8)
}
 0x64d   : > { %s1898_s16 = scalar_lea.hbm %s2370_s17, 128  ;;  %s1902_s25 = scalar_lea.hbm %s2472_s8, 256 }
 0x64e   : > { %p1899_p11 = scmp.ne.s32.totalorder %s2370_s17, %s1898_s16  ;;  %p1903_p7 = scmp.lt.u32.totalorder %s2370_s17, %s2472_s8 }
 0x64f   : > { %p1904_p9 = scmp.lt.u32.totalorder %s1902_s25, %s1898_s16  ;;  %p1906_p2 = scmp.lt.u32.totalorder %s1898_s16, %s2370_s17 }
 0x650   : > { %p1900_p1 = pnand %p1899_p11, %p2495_p0 }
 0x651   : > { %p1905_p12 = por %p1904_p9, %p1903_p7 }
 0x652   : > { %p1901_p3 = pneg %p1900_p1 }
 0x653   : > { %p1907_p13 = por %p1906_p2, %p1905_p12 }
 0x655   : > { %p1908_p6 = pnand %p1907_p13, %p1901_p3 }
 0x657   : > { %1911 = shalt.err (!%p1908_p6)
}
 0x658   : > { %1644 = dma.vmem_to_hbm [thread:$0]  (%p2495_p0), %s1309_s26, 128, %s2370_s17, %s1256_s0   ;;  %v1519_v26 = vld [vmem:[%s2468_s4] ss:$0 sm:$0xff] }
 0x659   : > { %s356_s1 = scalar_lea.vmem [#allocation9], %s2231_s14  ;;  %s2417_s16 = scalar_lea.hbm %s2469_s5, %s2330_s19 }
 0x65a   : > { %s1269_s15 = sshll.u32 %s356_s1, 4  ;;  %s1241_s17 = scalar_lea.sflag [#allocation5], %s2228_s21  ;;  %s2419_s15 = int_to_ptr.vmem [resolvable:$true] %s1269_s15 }
 0x65b   : > { %s1912_s26 = scalar_lea.vmem %s2419_s15, 128  ;;  %s2011_s14 = smov [#allocation9]  }
 0x65c   : > { %p1913_p10 = scmp.ne.s32.totalorder %s2419_s15, %s1912_s26  ;;  %s1916_s0 = sshll.u32 %s2011_s14, 4  ;;  %s1917_s0 = int_to_ptr.vmem [resolvable:$false] %s1916_s0 }
 0x65d   : > { %s1918_s11 = scalar_lea.vmem %s1917_s0, 256  ;;  %p1919_p8 = scmp.lt.s32.totalorder %s2419_s15, %s1917_s0 }
 0x65e   : > { %p1914_p4 = pnand %p1913_p10, %p2495_p0  ;;  %p1920_p11 = scmp.lt.s32.totalorder %s1918_s11, %s1912_s26 }
 0x660   : > { %p1915_p5 = pneg %p1914_p4  ;;  %p1921_p1 = por %p1920_p11, %p1919_p8 }
 0x662   : > { %p1922_p3 = pnand %p1921_p1, %p1915_p5 }
 0x6ef   : > { %v1235_v27 = vpop.f32.mrb[6].mxu0 }
 0x6f0   : > { %v1236_v28 = vadd.f32 %v1519_v26, %v1235_v27  ;;  %v1618_v29 = vpop.f32.mrb[7].mxu0 }
 0x6f2   : > { %1239 = vst.msk [vmem:[%s356_s1] sm:$0xff] %vm390_vm1, %v1236_v28 }
 0x6f3   : > { %1925 = shalt.err (!%p1922_p3)
}
 0x6f4   : > { %s1926_s21 = scalar_lea.hbm %s2417_s16, 128  ;;  %s1930_s25 = scalar_lea.hbm %s2469_s5, 256 }
 0x6f5   : > { %p1927_p7 = scmp.ne.s32.totalorder %s2417_s16, %s1926_s21  ;;  %p1931_p2 = scmp.lt.u32.totalorder %s2417_s16, %s2469_s5 }
 0x6f6   : > { %p1932_p13 = scmp.lt.u32.totalorder %s1930_s25, %s1926_s21  ;;  %p1934_p10 = scmp.lt.u32.totalorder %s1926_s21, %s2417_s16 }
 0x6f7   : > { %p1928_p9 = pnand %p1927_p7, %p2495_p0 }
 0x6f8   : > { %p1933_p6 = por %p1932_p13, %p1931_p2 }
 0x6f9   : > { %p1929_p12 = pneg %p1928_p9 }
 0x6fa   : > { %p1935_p4 = por %p1934_p10, %p1933_p6 }
 0x6fc   : > { %p1936_p5 = pnand %p1935_p4, %p1929_p12 }
 0x6fe   : > { %1939 = shalt.err (!%p1936_p5)
}
 0x6ff   : > { %1641 = dma.vmem_to_hbm [thread:$0]  (%p2495_p0), %s2419_s15, 128, %s2417_s16, %s1241_s17  }
 0x700 PF: > { %s1320_s9 = sand.u32 1, %s1978_s27   ;;  %p2496_p8 = scmp.ne.s32.totalorder %s2482_s12, 0 }
 0x701   : > { %p2497_p11 = scmp.ge.s32.totalorder %s1990_s30, 2  ;;  %s1321_s3 = scalar_lea.sflag [#allocation5], %s1320_s9 }
 0x703   : > { %p1661_p1 = pnand %p2497_p11, %p2496_p8 }
 0x705   : > { %1965 = dma.done.wait (!%p1661_p1), %s1321_s3, 128  }
 0x706   : > { %1967 = vsyncadd (!%p1661_p1), %s1321_s3, 4294967168  ;;  %s2498_s1 = sadd.s32 4294967294, %s1990_s30  }
 0x707   : > { %s1329_s18 = sand.u32 1, %s2498_s1  }
 0x708   : > { %s1330_s24 = scalar_lea.sflag [#allocation11], %s1329_s18 }
 0x709   : > { %1969 = dma.done.wait (!%p1661_p1), %s1330_s24, 256  }
 0x70a   : > { %1971 = vsyncadd (!%p1661_p1), %s1330_s24, 4294967040  ;;  %s1348_s22 = scalar_lea.sflag [#allocation14], %s1320_s9 }
 0x70b   : > { %1973 = dma.done.wait (!%p1661_p1), %s1348_s22, 128  }
 0x70c   : > { %1975 = vsyncadd (!%p1661_p1), %s1348_s22, 4294967168  ;;  %p29_p0 = scmp.ge.s32.totalorder %s2169_s20, 4   ;;  %s2499_s27 = smov %s1982_s28 }
 0x70d   : > { %s2500_s28 = smov %s1986_s29  ;;  %s2501_s29 = smov %s2185_s23 }
 0x70e   : > { %s2502_s30 = smov %s2169_s20  ;;  %31 = sbr.rel (!%p29_p0) target bundleno = 15 (0xf), region = 142 }
 0x715   :  { %1353 = vsyncpa [#allocation4], 1 }
 0x716   :  { %1355 = vsyncpa [#allocation4 + $0x1], 1 }
 0x717   :  { %1356 = vsyncpa [#allocation7], 1 }
 0x718   :  { %1357 = vsyncpa [#allocation5], 1 }
 0x719   :  { %1359 = vsyncpa [#allocation5 + $0x1], 1 }
 0x71a   :  { %1360 = vsyncpa [#allocation11], 1 }
 0x71b   :  { %1362 = vsyncpa [#allocation11 + $0x1], 1 }
 0x71c   :  { %1363 = vsyncpa [#allocation14], 1 }
 0x71d   :  { %1365 = vsyncpa [#allocation14 + $0x1], 1 }

// kernel: tpu_custom_call.1
= control target key start
LH: loop header
LB: loop body
LE: loop exit
PB: predicated region body
PF: predicated region fallthrough
CT: control target
= control target key end

     0   :  { %s2464_s0 = inlined_call_operand.hbm [shape: f32[2,8,32], index: 0, kind: input, shape index: {}]   ;;  %s2465_s1 = inlined_call_operand.hbm [shape: f32[32,96], index: 1, kind: input, shape index: {}]   ;;  %s2466_s2 = inlined_call_operand.vmem [shape: f32[1,96], index: 2, kind: input, shape index: {}]   ;;  %s2467_s3 = inlined_call_operand.hbm [shape: f32[32,32], index: 3, kind: input, shape index: {}]   ;;  %s2468_s4 = inlined_call_operand.vmem [shape: f32[1,32], index: 4, kind: input, shape index: {}]   ;;  %s2469_s5 = inlined_call_operand.hbm [shape: f32[2,8,32], index: 5, kind: output, shape index: {0}]   ;;  %s2470_s6 = inlined_call_operand.hbm [shape: f32[2,8,32], index: 6, kind: output, shape index: {1}]   ;;  %s2471_s7 = inlined_call_operand.hbm [shape: f32[2,8,32], index: 7, kind: output, shape index: {2}]   ;;  %s2472_s8 = inlined_call_operand.hbm [shape: f32[2,8,32], index: 8, kind: output, shape index: {3}]  }
   0x1   :  { %2477 = sst [smem:[#allocation20_spill]] %s2464_s0 }
   0x2   :  { %2478 = sst [smem:[#allocation21_spill]] %s2465_s1 }
   0x3   :  { %2479 = sst [smem:[#allocation22_spill]] %s2466_s2 }
   0x4   :  { %2480 = sst [smem:[#allocation23_spill]] %s2467_s3 }
   0x5   :  { %14 = vsyncpa [#allocation4], 0 }
   0x6   :  { %16 = vsyncpa [#allocation4 + $0x1], 0 }
   0x7   :  { %17 = vsyncpa [#allocation7], 0 }
   0x8   :  { %18 = vsyncpa [#allocation5], 0 }
   0x9   :  { %20 = vsyncpa [#allocation5 + $0x1], 0 }
   0xa   :  { %21 = vsyncpa [#allocation11], 0 }
   0xb   :  { %23 = vsyncpa [#allocation11 + $0x1], 0 }
   0xc   :  { %24 = vsyncpa [#allocation14], 0 }
   0xd   :  { %26 = vsyncpa [#allocation14 + $0x1], 0  ;;  %s2057_s27 = smov 0   ;;  %s2059_s28 = smov 0  }
   0xe   :  { %s2061_s29 = smov 0   ;;  %s2063_s30 = smov 0  }
   0xf LB: > { %s2078_s9 = sadd.s32 4294967295, %s1990_s30   ;;  %s2474_s10 = sadd.s32 4294967294, %s1990_s30   ;;  %s1990_s30 = sphi %s2063_s30, %s2502_s30   ;;  %s1986_s29 = sphi %s2061_s29, %s2501_s29   ;;  %s1982_s28 = sphi %s2059_s28, %s2500_s28   ;;  %s1978_s27 = sphi %s2057_s27, %s2499_s27  }
  0x10   : > { %p52_p0 = scmp.ne.s32.totalorder %s1982_s28, %s1978_s27  ;;  %p2473_p1 = scmp.eq.s32.totalorder %s2078_s9, 0 }
  0x11   : > { %p166_p3 = scmp.eq.s32.totalorder %s2474_s10, 1  ;;  %p1491_p5 = scmp.ge.s32.totalorder %s1990_s30, 1 }
  0x12   : > { %p2089_p4 = por %p2473_p1, %p52_p0  ;;  %p251_p7 = scmp.lt.s32.totalorder %s1990_s30, 3 }
  0x13   : > { %p2094_p6 = por %p166_p3, %p52_p0  ;;  %s1992_s14 = smov [#allocation6]  }
  0x14   : > { %s2481_s11 = scalar_select %p2089_p4, 1, 0 }
  0x15   : > { %s2482_s12 = scalar_select %p2094_p6, 1, 0 }
  0x16   : > { %p2099_p8 = pnand %p1491_p5, %p251_p7  ;;  %s263_s15 = sshll.u32 %s1992_s14, 4  ;;  %s2103_s15 = int_to_ptr.vmem [resolvable:$true] %s263_s15 }
  0x17   : > { %s1993_s17 = smov [#allocation8]   ;;  %s2485_s1 = sld [smem:[#allocation21_spill]] }
  0x18   : > { %p1649_p9 = pneg %p2099_p8  ;;  %s279_s18 = sshll.u32 %s1993_s17, 4  ;;  %s2114_s18 = int_to_ptr.vmem [resolvable:$true] %s279_s18 }
  0x1a   : > { %p2110_p11 = pnand %p1649_p9, %p2473_p1 }
  0x1c   : > { %p1744_p13 = pneg %p2110_p11 }
  0x1d   : > { %s1742_s21 = scalar_lea.hbm %s2485_s1, 512 }
  0x1e   : > { %p1743_p12 = scmp.ne.s32.totalorder %s2485_s1, %s1742_s21  ;;  %p1749_p5 = scmp.lt.u32.totalorder %s1742_s21, %s2485_s1 }
  0x20   : > { %p1745_p0 = pnand %p1744_p13, %p1743_p12 }
  0x22   : > { %p1746_p3 = pneg %p1745_p0 }
  0x24   : > { %p1751_p7 = pnand %p1749_p5, %p1746_p3 }
  0x26   : > { %1754 = shalt.err (!%p1751_p7)
}
  0x27   : > { %s1755_s26 = scalar_lea.vmem %s2103_s15, 512  ;;  %p1763_p2 = scmp.lt.s32.totalorder %s2103_s15, %s2103_s15 }
  0x28   : > { %p1756_p9 = scmp.ne.s32.totalorder %s2103_s15, %s1755_s26  ;;  %p1764_p12 = scmp.lt.s32.totalorder %s1755_s26, %s1755_s26 }
  0x2a   : > { %p1758_p10 = pnand %p1756_p9, %p1744_p13  ;;  %p1765_p0 = por %p1764_p12, %p1763_p2 }
  0x2c   : > { %p1759_p1 = pneg %p1758_p10 }
  0x2e   : > { %p1766_p6 = pnand %p1765_p0, %p1759_p1 }
  0x30   : > { %1769 = shalt.err (!%p1766_p6)
}
  0x31   : > { %s1994_s14 = smov 128   ;;  %s1995_s17 = smov 8  }
  0x32   : > { %1652 = dma.hbm_to_vmem [thread:$0]  (!%p2110_p11), %s2485_s1, 512, %s2103_s15, [#allocation7], %s1994_s14, %s1994_s14, %s1995_s17  }
  0x33   : > { %s2486_s3 = sld [smem:[#allocation23_spill]] }
  0x39   : > { %s1770_s23 = scalar_lea.hbm %s2486_s3, 512 }
  0x3a   : > { %p1771_p2 = scmp.ne.s32.totalorder %s2486_s3, %s1770_s23  ;;  %p1777_p10 = scmp.lt.u32.totalorder %s1770_s23, %s2486_s3 }
  0x3c   : > { %p1773_p1 = pnand %p1771_p2, %p1744_p13 }
  0x3e   : > { %p1774_p6 = pneg %p1773_p1 }
  0x40   : > { %p1779_p3 = pnand %p1777_p10, %p1774_p6 }
  0x42   : > { %1782 = shalt.err (!%p1779_p3)
}
  0x43   : > { %s1783_s15 = scalar_lea.vmem %s2114_s18, 512  ;;  %p1791_p12 = scmp.lt.s32.totalorder %s2114_s18, %s2114_s18 }
  0x44   : > { %p1784_p5 = scmp.ne.s32.totalorder %s2114_s18, %s1783_s15  ;;  %p1792_p0 = scmp.lt.s32.totalorder %s1783_s15, %s1783_s15 }
  0x46   : > { %p1786_p7 = pnand %p1784_p5, %p1744_p13  ;;  %p1793_p2 = por %p1792_p0, %p1791_p12 }
  0x48   : > { %p1787_p9 = pneg %p1786_p7 }
  0x4a   : > { %p1794_p1 = pnand %p1793_p2, %p1787_p9 }
  0x4c   : > { %1797 = shalt.err (!%p1794_p1)
}
  0x4d   : > { %1655 = dma.hbm_to_vmem [thread:$0]  (!%p2110_p11), %s2486_s3, 512, %s2114_s18, [#allocation7], %s1994_s14, %s1994_s14, %s1995_s17  }
  0x4e   : > { %s2169_s20 = sadd.s32 1, %s1990_s30   ;;  %s39_s16 = sadd.s32 1, %s1986_s29 }
  0x4f   : > { %s36_s21 = ssub.s32 %s1990_s30, %s2169_s20  ;;  %p46_p13 = scmp.ne.s32.totalorder %s1986_s29, %s1982_s28 }
  0x50   : > { %p37_p6 = scmp.eq.s32.totalorder %s36_s21, 0  ;;  %p47_p10 = scmp.eq.s32.totalorder %s1990_s30, 0 }
  0x51   : > { %p2487_p3 = scmp.eq.s32.totalorder %s2078_s9, 1  ;;  %p1675_p7 = scmp.lt.s32.totalorder %s1990_s30, 2 }
  0x52   : > { %s2185_s23 = scalar_select %p37_p6, %s1986_s29, %s39_s16  }
  0x53   : > { %p2179_p5 = por %p2487_p3, %p46_p13  ;;  %p48_p9 = por %p47_p10, %p46_p13 }
  0x54   : > { %s296_s24 = sand.u32 1, %s1986_s29   ;;  %s1496_s18 = sshll.u32 %s1990_s30, 7 }
  0x55   : > { %s2488_s22 = scalar_select %p2179_p5, 1, 0 }
  0x56   : > { %s1495_s25 = sshll.u32 %s296_s24, 3  ;;  %s2489_s0 = sld [smem:[#allocation20_spill]] }
  0x57   : > { %s300_s15 = scalar_lea.vmem [#allocation3], %s1495_s25  ;;  %p2196_p11 = pnand %p1675_p7, %p48_p9 }
  0x58   : > { %s307_s10 = sshll.u32 %s300_s15, 4  ;;  %s297_s16 = scalar_lea.sflag [#allocation4], %s296_s24  ;;  %s2194_s10 = int_to_ptr.vmem [resolvable:$true] %s307_s10 }
  0x59   : > { %p1800_p0 = pneg %p2196_p11 }
  0x5c   : > { %s2192_s26 = scalar_lea.hbm %s2489_s0, %s1496_s18  ;;  %s1803_s14 = scalar_lea.hbm %s2489_s0, 256 }
  0x5d   : > { %s1798_s21 = scalar_lea.hbm %s2192_s26, 128  ;;  %p1804_p13 = scmp.lt.u32.totalorder %s2192_s26, %s2489_s0 }
  0x5e   : > { %p1799_p12 = scmp.ne.s32.totalorder %s2192_s26, %s1798_s21  ;;  %p1805_p6 = scmp.lt.u32.totalorder %s1803_s14, %s1798_s21 }
  0x5f   : > { %p1807_p3 = scmp.lt.u32.totalorder %s1798_s21, %s2192_s26 }
  0x60   : > { %p1801_p2 = pnand %p1800_p0, %p1799_p12  ;;  %p1806_p10 = por %p1805_p6, %p1804_p13 }
  0x62   : > { %p1802_p1 = pneg %p1801_p2  ;;  %p1808_p7 = por %p1807_p3, %p1806_p10 }
  0x64   : > { %p1809_p9 = pnand %p1808_p7, %p1802_p1 }
  0x66   : > { %1812 = shalt.err (!%p1809_p9)
}
  0x67   : > { %s1813_s24 = scalar_lea.vmem %s2194_s10, 128  ;;  %s1996_s18 = smov [#allocation3]  }
  0x68   : > { %p1814_p12 = scmp.ne.s32.totalorder %s2194_s10, %s1813_s24  ;;  %s1818_s25 = sshll.u32 %s1996_s18, 4  ;;  %s1819_s25 = int_to_ptr.vmem [resolvable:$false] %s1818_s25 }
  0x69   : > { %s1820_s17 = scalar_lea.vmem %s1819_s25, 256  ;;  %p1821_p4 = scmp.lt.s32.totalorder %s2194_s10, %s1819_s25 }
  0x6a   : > { %p1816_p2 = pnand %p1814_p12, %p1800_p0  ;;  %p1822_p13 = scmp.lt.s32.totalorder %s1820_s17, %s1813_s24 }
  0x6c   : > { %p1817_p5 = pneg %p1816_p2  ;;  %p1823_p6 = por %p1822_p13, %p1821_p4 }
  0x6e   : > { %p1824_p10 = pnand %p1823_p6, %p1817_p5 }
  0x70   : > { %1827 = shalt.err (!%p1824_p10)
}
  0x71   : > { %1659 = dma.hbm_to_vmem [thread:$0]  (!%p2196_p11), %s2192_s26, 128, %s2194_s10, %s297_s16  }
  0x72   : > { %316 = sbr.rel (%p2099_p8) target bundleno = 1792 (0x700), region = 40  ;;  %s2228_s21 = sand.u32 (!%p2099_p8), 1, %s1982_s28  }
  0x73   : > { %s2231_s14 = sshll.u32 (!%p2099_p8), %s2228_s21, 3  ;;  %s319_s15 = scalar_lea.sflag (!%p2099_p8), [#allocation4], %s2228_s21 }
  0x74   : > { %s322_s24 = scalar_lea.vmem (!%p2099_p8), [#allocation3], %s2231_s14  ;;  %p2491_p4 = scmp.ne.s32.totalorder (!%p2099_p8), %s2481_s11, 0 }
  0x79   : > { %1957 = dma.done.wait (%p2491_p4), %s319_s15, 128  }
  0x7a   : > { %1959 = vsyncadd (%p2491_p4), %s319_s15, 4294967168  ;;  %p2492_p5 = scmp.eq.s32.totalorder %s2078_s9, 0 }
  0x7c   : > { %1961 = dma.done.wait (%p2492_p5), [#allocation7], 1024   ;;  %p2493_p8 = pmov %p2492_p5 }
  0x7d   : > { %v1997_v0 = vmov 0.0|0.0   ;;  %vm1998_vm0 = vmmov 0   ;;  %v1999_v1 = vmov 0.0   ;;  %v379_v2 = vld [vmem:[#allocation6] sm:$0xff]  ;;  %v380_v3 = vld [vmem:[#allocation6 + $0x8] sm:$0xff]  ;;  %v381_v4 = vld [vmem:[#allocation6 + $0x10] sm:$0xff] }
  0x7e   : > { %1963 = vsyncadd (%p2493_p8), [#allocation7], 4294966272  ;;  %1619 = vmatprep.subr.bf16.mxu0 %v1997_v0  ;;  %1565 = vmatprep.mubr.msk.f32.mxu0 %vm1998_vm0, %v1999_v1  ;;  %v1620_v5 = vpack.c.bf16 %v380_v3, %v379_v2  ;;  %v382_v6 = vld [vmem:[#allocation6 + $0x18] sm:$0xff]  ;;  %vm390_vm1 = vcmask 261120   ;;  %s2494_s2 = sld [smem:[#allocation22_spill]]  ;;  %s2258_s26 = scalar_lea.vmem [#allocation10], %s2231_s14 }
  0x7f   : > { %1568 = vmatprep.subr.mxu1 %v1999_v1  ;;  %1570 = vmatprep.mubr.msk.f32.mxu1 %vm1998_vm0, %v1999_v1  ;;  %v1623_v7 = vpack.c.bf16 %v382_v6, %v381_v4  ;;  %v378_v8 = vld [vmem:[%s322_s24] sm:$0xff]  ;;  %s2000_s10 = smov 64   ;;  %s2001_s19 = smov 96   ;;  %vm478_vm2 = vcmask 64512   ;;  %v1155_v6 = vld [vmem:[#allocation8] sm:$0xff]  ;;  %vm810_vm3 = vcmask 130112  }
  0x80   : > { %1621 = vmatpush3.bf16.msra.mxu0 %v1620_v5  ;;  %s2263_s16 = scalar_lea.vmem [#allocation13], %s2231_s14  ;;  %s2268_s18 = scalar_lea.vmem [#allocation12], %s2231_s14  ;;  %vm981_vm4 = vcmask 195712   ;;  %vm1152_vm5 = vcmask 261312  }
  0x81   : > { %1622 = vmatprep.subr.bf16.mxu0 %v1997_v0  ;;  %s2002_s25 = smov 120   ;;  %s2003_s17 = smov 112  }
  0x82   : > { %s2004_s15 = smov 104   ;;  %s2005_s24 = smov 8  }
  0x83   : > { %s2006_s11 = smov 16   ;;  %s2007_s13 = smov 24  }
  0x84   : > { %1624 = vmatpush3.bf16.msra.mxu0 %v1623_v7  ;;  %v1505_v9 = vld [vmem:[%s2494_s2] ss:$0 sm:$0xff]  ;;  %p2495_p0 = scmp.ne.s32.totalorder %s2488_s22, 0  ;;  %s2008_s0 = smov [#allocation10]  }
  0x85   : > { %1588 = vmatprep.subr.mxu0 %v1999_v1  ;;  %v1156_v7 = vld [vmem:[#allocation8 + $0x8] sm:$0xff]  ;;  %s1832_s1 = sshll.u32 %s2008_s0, 4  ;;  %s1833_s1 = int_to_ptr.vmem [resolvable:$false] %s1832_s1 }
  0x87   : > { %1566 = vmatmul.mubr.msk.f32.vlgmr.msra.gmra.mrb[0].mxu0 %vm390_vm1, %v378_v8  ;;  %v1157_v8 = vld [vmem:[#allocation8 + $0x10] sm:$0xff] }
  0x88   : > { %1590 = vmatprep.mubr.msk.f32.mxu0 %vm1998_vm0, %v1999_v1 }
 0x15a   : > { %v460_v10 = vpop.f32.mrb[0].mxu0 }
 0x15b   : > { %v461_v11 = vadd.f32 %v1505_v9, %v460_v10  ;;  %v1567_v12 = vpop.f32.mrb[1].mxu0  ;;  %v1158_v9 = vld [vmem:[#allocation8 + $0x18] sm:$0xff] }
 0x15c   : > { %v1629_v12 = vpack.c.bf16 %v1158_v9, %v1157_v8 }
 0x15d   : > { %464 = vst.msk [vmem:[%s2258_s26] sm:$0xff] %vm390_vm1, %v461_v11  ;;  %470 = vrot.lane.b32.xlu1 %v461_v11, %s2000_s10  ;;  %466 = vrot.lane.b32.xlu0 %v461_v11, %s2001_s19  ;;  %s1245_s10 = sand.u32 1, %s2078_s9   ;;  %s2330_s19 = sshll.u32 %s2078_s9, 7 }
 0x15e   : > { %s1834_s9 = scalar_lea.vmem %s1833_s1, 256 }
 0x164   : > { %v474_v15 = vld [vmem:[%s2258_s26] sm:$0xff] }
 0x165   : > { %v475_v17 = vmul.f32 0.35355338, %v474_v15 }
 0x1cf   : > { %v471_v13 = vpop.permute.xlu1 %470  ;;  %v467_v14 = vpop.permute.xlu0 %466 }
 0x1d0   : > { %473 = vst.msk [vmem:[%s2263_s16] sm:$0xff] %vm390_vm1, %v471_v13  ;;  %469 = vst.msk [vmem:[%s2268_s18] sm:$0xff] %vm390_vm1, %v467_v14 }
 0x1d7   : > { %v476_v16 = vld [vmem:[%s2268_s18] sm:$0xff]  ;;  %v477_v18 = vld [vmem:[%s2263_s16] sm:$0xff] }
 0x1d8   : > { %642 = vrot.lane.b32.xlu1 %v476_v16, %s2002_s25  ;;  %1569 = vmatpush3.xpose.msk.msra.mxu1 %vm478_vm2, %v476_v16 }
 0x1d9   : > { %1573 = vmatprep.subr.mxu1 %v1999_v1 }
 0x1db   : > { %1571 = vmatmul.mubr.msk.f32.vlgmr.msra.gmra.mrb[0].mxu1 %vm478_vm2, %v475_v17 }
 0x1dc   : > { %640 = vrot.lane.b32.xlu1 %v475_v17, %s2002_s25  ;;  %1574 = vmatpush3.msra.mxu1 %v477_v18 }
 0x1dd   : > { %1575 = vmatprep.mubr.msk.f32.mxu1 %vm1998_vm0, %v1999_v1  ;;  %1578 = vmatprep.subr.mxu1 %v1999_v1 }
 0x1e0   : > { %814 = vrot.lane.b32.xlu1 %v476_v16, %s2003_s17 }
 0x1e4   : > { %812 = vrot.lane.b32.xlu1 %v475_v17, %s2003_s17 }
 0x1e8   : > { %985 = vrot.lane.b32.xlu1 %v476_v16, %s2004_s15 }
 0x1ec   : > { %983 = vrot.lane.b32.xlu1 %v475_v17, %s2004_s15 }
 0x24a   : > { %v643_v19 = vpop.permute.xlu1 %642 }
 0x24e   : > { %v641_v20 = vpop.permute.xlu1 %640 }
 0x252   : > { %v815_v21 = vpop.permute.xlu1 %814 }
 0x253   : > { %1589 = vmatpush3.xpose.msk.msra.mxu0 %vm478_vm2, %v815_v21 }
 0x254   : > { %1598 = vmatprep.subr.mxu0 %v1999_v1 }
 0x256   : > { %v813_v22 = vpop.permute.xlu1 %812 }
 0x257   : > { %1591 = vmatmul.mubr.msk.f32.vlgmr.msra.gmra.mrb[2].mxu0 %vm478_vm2, %v813_v22 }
 0x258   : > { %1600 = vmatprep.mubr.msk.f32.mxu0 %vm1998_vm0, %v1999_v1 }
 0x25a   : > { %v986_v23 = vpop.permute.xlu1 %985 }
 0x25b   : > { %1599 = vmatpush3.xpose.msk.msra.mxu0 %vm478_vm2, %v986_v23 }
 0x25c   : > { %1625 = vmatprep.subr.bf16.mxu0 %v1997_v0 }
 0x25e   : > { %v984_v24 = vpop.permute.xlu1 %983 }
 0x25f   : > { %1601 = vmatmul.mubr.msk.f32.vlgmr.msra.gmra.mrb[4].mxu0 %vm478_vm2, %v984_v24 }
 0x260   : > { %1616 = vmatprep.mubr.msk.f32.mxu0 %vm1998_vm0, %v1999_v1 }
 0x2ae   : > { %v551_v25 = vpop.f32.mrb[0].mxu1 }
 0x2af   : > { %v1572_v26 = vpop.f32.mrb[1].mxu1  ;;  %v555_v27 = vsel %vm478_vm2, %v551_v25, -inf }
 0x2b0   : > { %556 = vmax.xlane.f32.xlu0 %v555_v27 }
 0x2c6   : > { %728 = vrot.lane.b32.xlu0 %v477_v18, %s2002_s25 }
 0x32a   : > { %v886_v28 = vpop.f32.mrb[2].mxu0 }
 0x32b   : > { %v1592_v29 = vpop.f32.mrb[3].mxu0  ;;  %v890_v30 = vsel %vm478_vm2, %v886_v28, -inf }
 0x32c   : > { %891 = vmax.xlane.f32.xlu0 %v890_v30 }
 0x332   : > { %v1057_v31 = vpop.f32.mrb[4].mxu0 }
 0x333   : > { %v1602_v32 = vpop.f32.mrb[5].mxu0  ;;  %v1061_v33 = vsel %vm478_vm2, %v1057_v31, -inf }
 0x334   : > { %1062 = vmax.xlane.f32.xlu0 %v1061_v33 }
 0x33d   : > { %v557_v34 = vpop.xlane.xlu0 %556 }
 0x33e   : > { %v558_v35 = vsub.f32 %v551_v25, %v557_v34 }
 0x340   : > { %v559_v36 = vmul.f32 1.442695, %v558_v35 }
 0x341   : > { %v729_v38 = vpop.permute.xlu0 %728 }
 0x342   : > { %1726 = vpow2.f32 %v559_v36 }
 0x34a   : > { %1070 = vrot.lane.b32.xlu0 %v477_v18, %s2004_s15  ;;  %s2336_s15 = scalar_lea.hbm %s2470_s6, %s2330_s19 }
 0x34c   : > { %v1727_v37 = vpop.eup %1726 }
 0x34d   : > { %1576 = vmatmul.mubr.msk.f32.vlgmr.msra.gmra.mrb[2].mxu1 %vm478_vm2, %v1727_v37  ;;  %v561_v61 = vsel %vm478_vm2, %v1727_v37, 0.0 }
 0x34e   : > { %1579 = vmatpush3.xpose.msk.msra.mxu1 %vm478_vm2, %v643_v19  ;;  %1580 = vmatprep.mubr.msk.f32.mxu1 %vm1998_vm0, %v1999_v1 }
 0x34f   : > { %1583 = vmatprep.subr.mxu1 %v1999_v1 }
 0x351   : > { %1581 = vmatmul.mubr.msk.f32.vlgmr.msra.gmra.mrb[4].mxu1 %vm478_vm2, %v641_v20 }
 0x352   : > { %1584 = vmatpush3.msra.mxu1 %v729_v38  ;;  %1585 = vmatprep.mubr.msk.f32.mxu1 %vm1998_vm0, %v1999_v1 }
 0x353   : > { %1593 = vmatprep.subr.mxu1 %v1999_v1 }
 0x3b9   : > { %v892_v44 = vpop.xlane.xlu0 %891 }
 0x3ba   : > { %v893_v45 = vsub.f32 %v886_v28, %v892_v44 }
 0x3bc   : > { %v894_v46 = vmul.f32 1.442695, %v893_v45 }
 0x3be   : > { %1728 = vpow2.f32 %v894_v46 }
 0x3c1   : > { %v1063_v49 = vpop.xlane.xlu0 %1062 }
 0x3c2   : > { %v1064_v50 = vsub.f32 %v1057_v31, %v1063_v49 }
 0x3c4   : > { %v1065_v53 = vmul.f32 1.442695, %v1064_v50 }
 0x3c5   : > { %v1071_v59 = vpop.permute.xlu0 %1070 }
 0x3c8   : > { %v1729_v47 = vpop.eup %1728 }
 0x3c9   : > { %v896_v48 = vsel %vm478_vm2, %v1729_v47, 0.0 }
 0x420   : > { %v633_v39 = vpop.f32.mrb[2].mxu1 }
 0x421   : > { %v1577_v40 = vpop.f32.mrb[3].mxu1 }
 0x424   : > { %v714_v41 = vpop.f32.mrb[4].mxu1 }
 0x425   : > { %v1582_v42 = vpop.f32.mrb[5].mxu1  ;;  %v718_v43 = vsel %vm478_vm2, %v714_v41, -inf }
 0x426   : > { %719 = vmax.xlane.f32.xlu1 %v718_v43 }
 0x437   : > { %899 = vrot.lane.b32.xlu1 %v477_v18, %s2003_s17 }
 0x45b   : > { %897 = vadd.xlane.f32.xlu1 %v896_v48 }
 0x4b3   : > { %v720_v51 = vpop.xlane.xlu1 %719 }
 0x4b4   : > { %v721_v52 = vsub.f32 %v714_v41, %v720_v51 }
 0x4b6   : > { %v722_v54 = vmul.f32 1.442695, %v721_v52 }
 0x4b7   : > { %v900_v56 = vpop.permute.xlu1 %899 }
 0x4b8   : > { %1730 = vpow2.f32 %v722_v54 }
 0x4b9   : > { %1732 = vpow2.f32 %v1065_v53 }
 0x4c2   : > { %v1731_v55 = vpop.eup %1730 }
 0x4c3   : > { %1586 = vmatmul.mubr.msk.f32.vlgmr.msra.gmra.mrb[6].mxu1 %vm478_vm2, %v1731_v55  ;;  %v724_v57 = vsel %vm478_vm2, %v1731_v55, 0.0  ;;  %v1733_v58 = vpop.eup %1732 }
 0x4c4   : > { %1594 = vmatpush3.msra.mxu1 %v900_v56  ;;  %725 = vadd.xlane.f32.xlu0 %v724_v57  ;;  %v1067_v60 = vsel %vm478_vm2, %v1733_v58, 0.0 }
 0x4c5   : > { %1595 = vmatprep.mubr.msk.f32.mxu1 %vm1998_vm0, %v1999_v1  ;;  %1603 = vmatprep.subr.mxu1 %v1999_v1 }
 0x4c7   : > { %1596 = vmatmul.mubr.msk.f32.vlgmr.msra.gmra.mrb[8].mxu1 %vm478_vm2, %v1729_v47 }
 0x4c8   : > { %1604 = vmatpush3.msra.mxu1 %v1071_v59  ;;  %1068 = vadd.xlane.f32.xlu0 %v1067_v60 }
 0x4c9   : > { %1605 = vmatprep.mubr.msk.f32.mxu1 %vm1998_vm0, %v1999_v1  ;;  %v1626_v1 = vpack.c.bf16 %v1156_v7, %v1155_v6 }
 0x4cb   : > { %1606 = vmatmul.mubr.msk.f32.vlgmr.msra.gmra.mrb[10].mxu1 %vm478_vm2, %v1733_v58  ;;  %1627 = vmatpush3.bf16.msra.mxu0 %v1626_v1 }
 0x4cc   : > { %562 = vadd.xlane.f32.xlu0 %v561_v61  ;;  %1628 = vmatprep.subr.bf16.mxu0 %v1997_v0 }
 0x4cf   : > { %1630 = vmatpush3.bf16.msra.mxu0 %v1629_v12 }
 0x4e8   : > { %v898_v5 = vpop.xlane.xlu1 %897 }
 0x551   : > { %v726_v62 = vpop.xlane.xlu0 %725 }
 0x555   : > { %v1069_v63 = vpop.xlane.xlu0 %1068 }
 0x559   : > { %v563_v2 = vpop.xlane.xlu0 %562 }
 0x55a   : > { %1734 = vrcp.f32 %v563_v2 }
 0x55b   : > { %1736 = vrcp.f32 %v726_v62 }
 0x55c   : > { %1738 = vrcp.f32 %v898_v5 }
 0x55d   : > { %1740 = vrcp.f32 %v1069_v63 }
 0x564   : > { %v1735_v3 = vpop.eup %1734 }
 0x565   : > { %v638_v4 = vmul.f32 %v1735_v3, %v633_v39  ;;  %v1737_v10 = vpop.eup %1736 }
 0x566   : > { %v1739_v15 = vpop.eup %1738 }
 0x567   : > { %639 = vst.msk [vmem:[#allocation2] sm:$0xff] %vm478_vm2, %v638_v4  ;;  %v1741_v19 = vpop.eup %1740 }
 0x596   : > { %v800_v11 = vpop.f32.mrb[6].mxu1 }
 0x597   : > { %v805_v13 = vmul.f32 %v1737_v10, %v800_v11  ;;  %v1587_v14 = vpop.f32.mrb[7].mxu1 }
 0x599   : > { %807 = vrot.lane.b32.xlu0 %v805_v13, %s2005_s24  ;;  %s1282_s24 = sshll.u32 %s2258_s26, 4  ;;  %s1283_s24 = int_to_ptr.vmem [resolvable:$true] %s1282_s24 }
 0x59a   : > { %v971_v16 = vpop.f32.mrb[8].mxu1  ;;  %p1835_p7 = scmp.lt.s32.totalorder %s1283_s24, %s1833_s1 }
 0x59b   : > { %v976_v17 = vmul.f32 %v1739_v15, %v971_v16  ;;  %v1597_v18 = vpop.f32.mrb[9].mxu1 }
 0x59d   : > { %978 = vrot.lane.b32.xlu1 %v976_v17, %s2006_s11  ;;  %s2339_s11 = scalar_lea.sflag [#allocation11], %s1245_s10 }
 0x59e   : > { %v1142_v20 = vpop.f32.mrb[10].mxu1 }
 0x59f   : > { %v1147_v21 = vmul.f32 %v1741_v19, %v1142_v20  ;;  %v1607_v22 = vpop.f32.mrb[11].mxu1 }
 0x5a1   : > { %1149 = vrot.lane.b32.xlu0 %v1147_v21, %s2007_s13  ;;  %s1828_s13 = scalar_lea.vmem %s1283_s24, 128 }
 0x5a2   : > { %p1829_p11 = scmp.ne.s32.totalorder %s1283_s24, %s1828_s13  ;;  %p1836_p9 = scmp.lt.s32.totalorder %s1834_s9, %s1828_s13 }
 0x5a4   : > { %p1830_p1 = pnand %p1829_p11, %p2495_p0  ;;  %p1837_p12 = por %p1836_p9, %p1835_p7 }
 0x5a6   : > { %p1831_p3 = pneg %p1830_p1 }
 0x5a8   : > { %p1838_p2 = pnand %p1837_p12, %p1831_p3 }
 0x60b   : > { %v808_v0 = vpop.permute.xlu0 %807 }
 0x60c   : > { %811 = vst.msk [vmem:[#allocation2] sm:$0xff] %vm810_vm3, %v808_v0 }
 0x60f   : > { %v979_v23 = vpop.permute.xlu1 %978 }
 0x610   : > { %982 = vst.msk [vmem:[#allocation2] sm:$0xff] %vm981_vm4, %v979_v23 }
 0x613   : > { %v1150_v24 = vpop.permute.xlu0 %1149 }
 0x614   : > { %1153 = vst.msk [vmem:[#allocation2] sm:$0xff] %vm1152_vm5, %v1150_v24 }
 0x61b   : > { %v1154_v25 = vld [vmem:[#allocation2] sm:$0xff] }
 0x61c   : > { %1617 = vmatmul.mubr.msk.f32.vlgmr.msra.gmra.mrb[6].mxu0 %vm390_vm1, %v1154_v25 }
 0x61d   : > { %1841 = shalt.err (!%p1838_p2)
}
 0x61e   : > { %s1842_s26 = scalar_lea.hbm %s2336_s15, 128  ;;  %s1846_s0 = scalar_lea.hbm %s2470_s6, 256 }
 0x61f   : > { %p1843_p13 = scmp.ne.s32.totalorder %s2336_s15, %s1842_s26  ;;  %p1847_p4 = scmp.lt.u32.totalorder %s2336_s15, %s2470_s6 }
 0x620   : > { %p1848_p5 = scmp.lt.u32.totalorder %s1846_s0, %s1842_s26  ;;  %p1850_p11 = scmp.lt.u32.totalorder %s1842_s26, %s2336_s15 }
 0x621   : > { %p1844_p6 = pnand %p1843_p13, %p2495_p0 }
 0x622   : > { %p1849_p8 = por %p1848_p5, %p1847_p4 }
 0x623   : > { %p1845_p10 = pneg %p1844_p6 }
 0x624   : > { %p1851_p1 = por %p1850_p11, %p1849_p8 }
 0x626   : > { %p1852_p3 = pnand %p1851_p1, %p1845_p10 }
 0x628   : > { %1855 = shalt.err (!%p1852_p3)
}
 0x629   : > { %1642 = dma.vmem_to_hbm [thread:$0]  (%p2495_p0), %s1283_s24, 128, %s2336_s15, %s2339_s11  }
 0x62a   : > { %s2363_s10 = scalar_lea.hbm %s2471_s7, %s2330_s19  ;;  %s1295_s25 = sshll.u32 %s2268_s18, 4  ;;  %s1296_s25 = int_to_ptr.vmem [resolvable:$true] %s1295_s25 }
 0x62b   : > { %s2370_s17 = scalar_lea.hbm %s2472_s8, %s2330_s19  ;;  %s1856_s1 = scalar_lea.vmem %s1296_s25, 128 }
 0x62c   : > { %p1857_p7 = scmp.ne.s32.totalorder %s1296_s25, %s1856_s1  ;;  %s2009_s2 = smov [#allocation12]  }
 0x62d   : > { %s1860_s3 = sshll.u32 %s2009_s2, 4  ;;  %s1861_s3 = int_to_ptr.vmem [resolvable:$false] %s1860_s3 }
 0x62e   : > { %p1858_p9 = pnand %p1857_p7, %p2495_p0  ;;  %s1862_s15 = scalar_lea.vmem %s1861_s3, 256 }
 0x62f   : > { %p1863_p2 = scmp.lt.s32.totalorder %s1296_s25, %s1861_s3  ;;  %p1864_p13 = scmp.lt.s32.totalorder %s1862_s15, %s1856_s1 }
 0x630   : > { %p1859_p12 = pneg %p1858_p9 }
 0x631   : > { %p1865_p6 = por %p1864_p13, %p1863_p2 }
 0x633   : > { %p1866_p10 = pnand %p1865_p6, %p1859_p12 }
 0x635   : > { %1869 = shalt.err (!%p1866_p10)
}
 0x636   : > { %s1870_s18 = scalar_lea.hbm %s2363_s10, 128  ;;  %s1874_s2 = scalar_lea.hbm %s2471_s7, 256 }
 0x637   : > { %p1871_p4 = scmp.ne.s32.totalorder %s2363_s10, %s1870_s18  ;;  %p1875_p11 = scmp.lt.u32.totalorder %s2363_s10, %s2471_s7 }
 0x638   : > { %p1876_p1 = scmp.lt.u32.totalorder %s1874_s2, %s1870_s18  ;;  %p1878_p7 = scmp.lt.u32.totalorder %s1870_s18, %s2363_s10 }
 0x639   : > { %p1872_p5 = pnand %p1871_p4, %p2495_p0 }
 0x63a   : > { %p1877_p3 = por %p1876_p1, %p1875_p11 }
 0x63b   : > { %p1873_p8 = pneg %p1872_p5 }
 0x63c   : > { %p1879_p9 = por %p1878_p7, %p1877_p3 }
 0x63e   : > { %p1880_p12 = pnand %p1879_p9, %p1873_p8 }
 0x640   : > { %1883 = shalt.err (!%p1880_p12)
}
 0x641   : > { %1643 = dma.vmem_to_hbm [thread:$0]  (%p2495_p0), %s1296_s25, 128, %s2363_s10, %s2339_s11  }
 0x642   : > { %s1308_s26 = sshll.u32 %s2263_s16, 4  ;;  %s1256_s0 = scalar_lea.sflag [#allocation14], %s2228_s21  ;;  %s1309_s26 = int_to_ptr.vmem [resolvable:$true] %s1308_s26 }
 0x643   : > { %s1884_s1 = scalar_lea.vmem %s1309_s26, 128  ;;  %s2010_s15 = smov [#allocation13]  }
 0x644   : > { %p1885_p2 = scmp.ne.s32.totalorder %s1309_s26, %s1884_s1  ;;  %s1888_s18 = sshll.u32 %s2010_s15, 4  ;;  %s1889_s18 = int_to_ptr.vmem [resolvable:$false] %s1888_s18 }
 0x645   : > { %s1890_s24 = scalar_lea.vmem %s1889_s18, 256  ;;  %p1891_p10 = scmp.lt.s32.totalorder %s1309_s26, %s1889_s18 }
 0x646   : > { %p1886_p13 = pnand %p1885_p2, %p2495_p0  ;;  %p1892_p4 = scmp.lt.s32.totalorder %s1890_s24, %s1884_s1 }
 0x648   : > { %p1887_p6 = pneg %p1886_p13  ;;  %p1893_p5 = por %p1892_p4, %p1891_p10 }
 0x64a   : > { %p1894_p8 = pnand %p1893_p5, %p1887_p6 }
 0x64c   : > { %1897 = shalt.err (!%p1894_p8)
}
 0x64d   : > { %s1898_s16 = scalar_lea.hbm %s2370_s17, 128  ;;  %s1902_s25 = scalar_lea.hbm %s2472_s8, 256 }
 0x64e   : > { %p1899_p11 = scmp.ne.s32.totalorder %s2370_s17, %s1898_s16  ;;  %p1903_p7 = scmp.lt.u32.totalorder %s2370_s17, %s2472_s8 }
 0x64f   : > { %p1904_p9 = scmp.lt.u32.totalorder %s1902_s25, %s1898_s16  ;;  %p1906_p2 = scmp.lt.u32.totalorder %s1898_s16, %s2370_s17 }
 0x650   : > { %p1900_p1 = pnand %p1899_p11, %p2495_p0 }
 0x651   : > { %p1905_p12 = por %p1904_p9, %p1903_p7 }
 0x652   : > { %p1901_p3 = pneg %p1900_p1 }
 0x653   : > { %p1907_p13 = por %p1906_p2, %p1905_p12 }
 0x655   : > { %p1908_p6 = pnand %p1907_p13, %p1901_p3 }
 0x657   : > { %1911 = shalt.err (!%p1908_p6)
}
 0x658   : > { %1644 = dma.vmem_to_hbm [thread:$0]  (%p2495_p0), %s1309_s26, 128, %s2370_s17, %s1256_s0   ;;  %v1519_v26 = vld [vmem:[%s2468_s4] ss:$0 sm:$0xff] }
 0x659   : > { %s356_s1 = scalar_lea.vmem [#allocation9], %s2231_s14  ;;  %s2417_s16 = scalar_lea.hbm %s2469_s5, %s2330_s19 }
 0x65a   : > { %s1269_s15 = sshll.u32 %s356_s1, 4  ;;  %s1241_s17 = scalar_lea.sflag [#allocation5], %s2228_s21  ;;  %s2419_s15 = int_to_ptr.vmem [resolvable:$true] %s1269_s15 }
 0x65b   : > { %s1912_s26 = scalar_lea.vmem %s2419_s15, 128  ;;  %s2011_s14 = smov [#allocation9]  }
 0x65c   : > { %p1913_p10 = scmp.ne.s32.totalorder %s2419_s15, %s1912_s26  ;;  %s1916_s0 = sshll.u32 %s2011_s14, 4  ;;  %s1917_s0 = int_to_ptr.vmem [resolvable:$false] %s1916_s0 }
 0x65d   : > { %s1918_s11 = scalar_lea.vmem %s1917_s0, 256  ;;  %p1919_p8 = scmp.lt.s32.totalorder %s2419_s15, %s1917_s0 }
 0x65e   : > { %p1914_p4 = pnand %p1913_p10, %p2495_p0  ;;  %p1920_p11 = scmp.lt.s32.totalorder %s1918_s11, %s1912_s26 }
 0x660   : > { %p1915_p5 = pneg %p1914_p4  ;;  %p1921_p1 = por %p1920_p11, %p1919_p8 }
 0x662   : > { %p1922_p3 = pnand %p1921_p1, %p1915_p5 }
 0x6ef   : > { %v1235_v27 = vpop.f32.mrb[6].mxu0 }
 0x6f0   : > { %v1236_v28 = vadd.f32 %v1519_v26, %v1235_v27  ;;  %v1618_v29 = vpop.f32.mrb[7].mxu0 }
 0x6f2   : > { %1239 = vst.msk [vmem:[%s356_s1] sm:$0xff] %vm390_vm1, %v1236_v28 }
 0x6f3   : > { %1925 = shalt.err (!%p1922_p3)
}
 0x6f4   : > { %s1926_s21 = scalar_lea.hbm %s2417_s16, 128  ;;  %s1930_s25 = scalar_lea.hbm %s2469_s5, 256 }
 0x6f5   : > { %p1927_p7 = scmp.ne.s32.totalorder %s2417_s16, %s1926_s21  ;;  %p1931_p2 = scmp.lt.u32.totalorder %s2417_s16, %s2469_s5 }
 0x6f6   : > { %p1932_p13 = scmp.lt.u32.totalorder %s1930_s25, %s1926_s21  ;;  %p1934_p10 = scmp.lt.u32.totalorder %s1926_s21, %s2417_s16 }
 0x6f7   : > { %p1928_p9 = pnand %p1927_p7, %p2495_p0 }
 0x6f8   : > { %p1933_p6 = por %p1932_p13, %p1931_p2 }
 0x6f9   : > { %p1929_p12 = pneg %p1928_p9 }
 0x6fa   : > { %p1935_p4 = por %p1934_p10, %p1933_p6 }
 0x6fc   : > { %p1936_p5 = pnand %p1935_p4, %p1929_p12 }
 0x6fe   : > { %1939 = shalt.err (!%p1936_p5)
}
 0x6ff   : > { %1641 = dma.vmem_to_hbm [thread:$0]  (%p2495_p0), %s2419_s15, 128, %s2417_s16, %s1241_s17  }
 0x700 PF: > { %s1320_s9 = sand.u32 1, %s1978_s27   ;;  %p2496_p8 = scmp.ne.s32.totalorder %s2482_s12, 0 }
 0x701   : > { %p2497_p11 = scmp.ge.s32.totalorder %s1990_s30, 2  ;;  %s1321_s3 = scalar_lea.sflag [#allocation5], %s1320_s9 }
 0x703   : > { %p1661_p1 = pnand %p2497_p11, %p2496_p8 }
 0x705   : > { %1965 = dma.done.wait (!%p1661_p1), %s1321_s3, 128  }
 0x706   : > { %1967 = vsyncadd (!%p1661_p1), %s1321_s3, 4294967168  ;;  %s2498_s1 = sadd.s32 4294967294, %s1990_s30  }
 0x707   : > { %s1329_s18 = sand.u32 1, %s2498_s1  }
 0x708   : > { %s1330_s24 = scalar_lea.sflag [#allocation11], %s1329_s18 }
 0x709   : > { %1969 = dma.done.wait (!%p1661_p1), %s1330_s24, 256  }
 0x70a   : > { %1971 = vsyncadd (!%p1661_p1), %s1330_s24, 4294967040  ;;  %s1348_s22 = scalar_lea.sflag [#allocation14], %s1320_s9 }
 0x70b   : > { %1973 = dma.done.wait (!%p1661_p1), %s1348_s22, 128  }
 0x70c   : > { %1975 = vsyncadd (!%p1661_p1), %s1348_s22, 4294967168  ;;  %p29_p0 = scmp.ge.s32.totalorder %s2169_s20, 4   ;;  %s2499_s27 = smov %s1982_s28 }
 0x70d   : > { %s2500_s28 = smov %s1986_s29  ;;  %s2501_s29 = smov %s2185_s23 }
 0x70e   : > { %s2502_s30 = smov %s2169_s20  ;;  %31 = sbr.rel (!%p29_p0) target bundleno = 15 (0xf), region = 142 }
 0x715   :  { %1353 = vsyncpa [#allocation4], 1 }
 0x716   :  { %1355 = vsyncpa [#allocation4 + $0x1], 1 }
 0x717   :  { %1356 = vsyncpa [#allocation7], 1 }
 0x718   :  { %1357 = vsyncpa [#allocation5], 1 }
 0x719   :  { %1359 = vsyncpa [#allocation5 + $0x1], 1 }
 0x71a   :  { %1360 = vsyncpa [#allocation11], 1 }
 0x71b   :  { %1362 = vsyncpa [#allocation11 + $0x1], 1 }
 0x71c   :  { %1363 = vsyncpa [#allocation14], 1 }
 0x71d   :  { %1365 = vsyncpa [#allocation14 + $0x1], 1 }

</bundles_post_ra>
